<compile_context>
chip_gen: v7x
topology: tpu7x:2x2x1
jax: 0.10.0
libtpu: 0.0.40
codegen_flags: <defaults>
</compile_context>

<pallas_src>
import functools

import jax
import jax.numpy as jnp
from jax.experimental import pallas as pl
from jax.experimental.pallas import tpu as pltpu

EPS = 1e-5  # PyTorch BatchNorm2d default


def _make_divisible(v, divisor, min_value=None):
    if min_value is None:
        min_value = divisor
    new_v = max(min_value, int(v + divisor / 2) // divisor * divisor)
    if new_v < 0.9 * v:
        new_v += divisor
    return new_v


# ----------------------------------------------------------------------------
# Pass A: expand (1x1) -> SiLU -> depthwise (kxk) -> SiLU, per (batch, H-tile)
# Outputs: z tile (bf16) + per-tile channel partial sums for the SE pool.
# ----------------------------------------------------------------------------
def _expand_dw_kernel(x_ref, w_exp_ref, t_exp_ref, w_dw_ref, t_dw_ref,
                      z_ref, psum_ref, xp_ref, *,
                      k, stride, pad, W, TH, HT, Wo, rows_in,
                      n_first, src_last, n_last, zb_last, expand_on_mxu):
    Cin = x_ref.shape[-1]
    Cexp = w_dw_ref.shape[-1]
    Wpad = W + 2 * pad
    t = pl.program_id(1)

    # Zero only the thin left/right column halos (never the whole scratch).
    col_zeros = jnp.zeros((rows_in, pad, Cexp), xp_ref.dtype)
    xp_ref[:, pl.ds(0, pad), :] = col_zeros
    xp_ref[:, pl.ds(pad + W, pad), :] = col_zeros

    def fill(dst_row, src_row, n_rows):
        # expand 1x1 conv (+folded BN) + SiLU for `n_rows` input rows,
        # written into the padded scratch at row `dst_row`.
        xs = x_ref[0, pl.ds(src_row, n_rows), :, :].astype(jnp.float32)  # (r, W, Cin)
        if expand_on_mxu:
            y = (jnp.dot(xs.reshape(n_rows * W, Cin).astype(jnp.bfloat16),
                         w_exp_ref[...], preferred_element_type=jnp.float32)
                 + t_exp_ref[...]).reshape(n_rows, W, Cexp)
        else:
            # tiny-K path: VPU broadcast-MAC instead of a degenerate MXU matmul
            y = jnp.broadcast_to(t_exp_ref[...].reshape(1, 1, Cexp),
                                 (n_rows, W, Cexp))
            for c in range(Cin):
                y = y + xs[:, :, c:c + 1] * w_exp_ref[c, :]
        y = y * jax.nn.sigmoid(y)                                   # SiLU
        xp_ref[pl.ds(dst_row, n_rows), pl.ds(pad, W), :] = y.astype(xp_ref.dtype)

    if HT == 1:
        xp_ref[pl.ds(0, pad), :, :] = jnp.zeros((pad, Wpad, Cexp), xp_ref.dtype)
        if zb_last > 0:
            xp_ref[pl.ds(rows_in - zb_last, zb_last), :, :] = jnp.zeros(
                (zb_last, Wpad, Cexp), xp_ref.dtype)
        fill(pad, 0, n_last)
    else:
        @pl.when(t == 0)
        def _():
            xp_ref[pl.ds(0, pad), :, :] = jnp.zeros((pad, Wpad, Cexp), xp_ref.dtype)
            fill(pad, 0, n_first)

        @pl.when(t == HT - 1)
        def _():
            if zb_last > 0:
                xp_ref[pl.ds(rows_in - zb_last, zb_last), :, :] = jnp.zeros(
                    (zb_last, Wpad, Cexp), xp_ref.dtype)
            fill(0, src_last, n_last)

        if HT > 2:
            @pl.when(jnp.logical_and(t > 0, t < HT - 1))
            def _():
                fill(0, t * TH * stride - pad, rows_in)

    # Depthwise kxk MAC loop (f32 accumulate; taps read from the VMEM scratch).
    acc = jnp.broadcast_to(t_dw_ref[...].reshape(1, 1, Cexp), (TH, Wo, Cexp))
    for dh in range(k):
        for dwc in range(k):
            if stride == 1:
                tap = xp_ref[pl.ds(dh, TH), pl.ds(dwc, Wo), :]
            else:
                tap = xp_ref[pl.ds(dh, TH, stride=stride),
                             pl.ds(dwc, Wo, stride=stride), :]
            acc = acc + tap.astype(jnp.float32) * w_dw_ref[dh * k + dwc, :]
    z = acc * jax.nn.sigmoid(acc)                                   # SiLU

    z_ref[0] = z.astype(z_ref.dtype)
    # per-tile channel partial sums for the SE squeeze (row-0 of an (8, Cexp) slab
    # to keep the out block (8,128)-friendly; wrapper reads [..., 0, :]).
    psum_ref[0, 0] = jnp.broadcast_to(z.sum(axis=(0, 1)).reshape(1, Cexp),
                                      (8, Cexp))


# ----------------------------------------------------------------------------
# Pass B: SE channel scale + project 1x1 (+folded BN, +folded residual gain),
# lane-dense flat output (1, TH, Wo*Cout) per (batch, H-tile).
# ----------------------------------------------------------------------------
def _se_project_kernel(z_ref, gate_ref, w_pr_ref, t_pr_ref, o_ref, *, proj_on_mxu):
    _, TH, Wo, Cexp = z_ref.shape
    Cout = w_pr_ref.shape[-1]
    zt = z_ref[0].astype(jnp.float32) * gate_ref[0].reshape(1, 1, Cexp)
    if proj_on_mxu:
        out = (jnp.dot(zt.reshape(TH * Wo, Cexp).astype(jnp.bfloat16),
                       w_pr_ref[...], preferred_element_type=jnp.float32)
               + t_pr_ref[...])
        o_ref[0] = out.reshape(TH, Wo * Cout)
    else:
        # small-N/K path: VPU MAC (avoids MXU push/pop latency for tiny matmuls)
        acc = jnp.broadcast_to(t_pr_ref[...].reshape(1, 1, Cout), (TH, Wo, Cout))
        for ce in range(Cexp):
            acc = acc + zt[:, :, ce:ce + 1] * w_pr_ref[ce, :]
        o_ref[0] = acc.reshape(TH, Wo * Cout)


# ----------------------------------------------------------------------------
# Tile-size selection from an explicit VMEM budget (v7x has only 64 MiB total).
# ----------------------------------------------------------------------------
def _pick_tile_rows(Ho, Wo, W, Cexp, Cout, k, stride, pad, budget_bytes=8 << 20):
    cands = [d for d in range(8, Ho + 1, 8) if Ho % d == 0]
    if not cands:
        return Ho

    def per_step_bytes(th):
        rows_in = (th - 1) * stride + k
        xp = rows_in * (W + 2 * pad) * Cexp * 4      # f32 padded scratch
        zblk = 2 * th * Wo * Cexp * 2                # double-buffered bf16 z tile
        oblk = 2 * th * Wo * Cout * 4                # double-buffered f32 out tile
        return xp + zblk + oblk

    fit = [d for d in cands if per_step_bytes(d) <= budget_bytes]
    return max(fit) if fit else min(cands)


# ----------------------------------------------------------------------------
# MBConvBlock forward (Pallas path), eval-mode semantics.
# ----------------------------------------------------------------------------
def mbconv_forward(x_nchw, p, cfg, tile_rows=None):
    stride, k, pad = cfg["stride"], cfg["ksize"], cfg["padding"]
    use_residual = cfg["use_residual"]

    # x is the smallest tensor in the block; this conversion is negligible and
    # vanishes in an NHWC-native network.
    x = jnp.transpose(x_nchw, (0, 2, 3, 1)).astype(jnp.float32)     # NHWC
    N, H, W, Cin = x.shape

    # -- fold BatchNorm (eval) + conv bias (+ residual gain) into weights/shifts
    def fold_pw(w4, b, bn, gain=1.0):
        gamma, beta, mean, var = bn
        s = gamma * jax.lax.rsqrt(var + EPS) * gain
        w2d = w4[:, :, 0, 0].T * s[None, :]                          # (Cin, Cout)
        t = beta * gain + (b - mean) * s
        return w2d, t.reshape(1, -1)

    w_exp, t_exp = fold_pw(p["expand"]["w"], p["expand"]["b"], p["expand"]["bn"])

    gamma, beta, mean, var = p["dw"]["bn"]
    s_dw = gamma * jax.lax.rsqrt(var + EPS)
    w_dw = (jnp.transpose(p["dw"]["w"][:, 0, :, :], (1, 2, 0)).reshape(k * k, -1)
            * s_dw[None, :])                                         # (k*k, Cexp)
    t_dw = (beta + (p["dw"]["b"] - mean) * s_dw).reshape(1, -1)

    w_se1 = p["se"]["w1"][:, :, 0, 0].T                              # (Cexp, Cse)
    b_se1 = p["se"]["b1"].reshape(1, -1)
    w_se2 = p["se"]["w2"][:, :, 0, 0].T                              # (Cse, Cexp)
    b_se2 = p["se"]["b2"].reshape(1, -1)

    # stochastic_depth is identity in eval -> residual means out = 2*project(z)
    # (the reference module literally does `y + y`); fold the 2x into project.
    gain = 2.0 if use_residual else 1.0
    w_pr, t_pr = fold_pw(p["proj"]["w"], p["proj"]["b"], p["proj"]["bn"], gain)

    Cexp, Cout = w_exp.shape[1], w_pr.shape[1]
    Ho = (H + 2 * pad - k) // stride + 1
    Wo = (W + 2 * pad - k) // stride + 1
    Wpad = W + 2 * pad

    expand_on_mxu = Cin > 8
    proj_on_mxu = Cexp >= 64

    TH = tile_rows if tile_rows is not None else _pick_tile_rows(
        Ho, Wo, W, Cexp, Cout, k, stride, pad)
    assert Ho % TH == 0 and (TH % 8 == 0 or TH == Ho), (TH, Ho)
    HT = Ho // TH
    rows_in = (TH - 1) * stride + k

    if HT == 1:
        n_last = min(H, rows_in - pad)
        zb_last = rows_in - pad - n_last
        n_first, src_last = n_last, 0
    else:
        n_first = rows_in - pad
        assert n_first <= H, "tile too tall for this image"
        src_last = (HT - 1) * TH * stride - pad
        zb_last = max(0, src_last + rows_in - H)
        n_last = rows_in - zb_last

    cparams = pltpu.CompilerParams(
        dimension_semantics=("parallel", "parallel"),
        vmem_limit_bytes=32 * 1024 * 1024)

    # -------- pass A: expand + depthwise (+ SE partial sums) ---------------
    kern_a = functools.partial(
        _expand_dw_kernel, k=k, stride=stride, pad=pad, W=W, TH=TH, HT=HT, Wo=Wo,
        rows_in=rows_in, n_first=n_first, src_last=src_last, n_last=n_last,
        zb_last=zb_last, expand_on_mxu=expand_on_mxu)
    w_exp_k = w_exp.astype(jnp.bfloat16) if expand_on_mxu else w_exp

    z, psum = pl.pallas_call(
        kern_a,
        out_shape=(jax.ShapeDtypeStruct((N, Ho, Wo, Cexp), jnp.bfloat16),
                   jax.ShapeDtypeStruct((N, HT, 8, Cexp), jnp.float32)),
        grid=(N, HT),
        in_specs=[
            pl.BlockSpec((1, H, W, Cin), lambda n, t: (n, 0, 0, 0)),
            pl.BlockSpec((Cin, Cexp), lambda n, t: (0, 0)),
            pl.BlockSpec((1, Cexp), lambda n, t: (0, 0)),
            pl.BlockSpec((k * k, Cexp), lambda n, t: (0, 0)),
            pl.BlockSpec((1, Cexp), lambda n, t: (0, 0)),
        ],
        out_specs=(pl.BlockSpec((1, TH, Wo, Cexp), lambda n, t: (n, t, 0, 0)),
                   pl.BlockSpec((1, 1, 8, Cexp), lambda n, t: (n, t, 0, 0))),
        scratch_shapes=[pltpu.VMEM((rows_in, Wpad, Cexp), jnp.float32)],
        compiler_params=cparams,
    )(x, w_exp_k, t_exp, w_dw, t_dw)

    # -------- SE gate: tiny (N, Cexp) FCs from the partial sums ------------
    pooled = psum[:, :, 0, :].sum(axis=1) * (1.0 / (Ho * Wo))        # (N, Cexp)
    h = pooled @ w_se1 + b_se1
    h = h * jax.nn.sigmoid(h)                                        # SiLU
    gate = jax.nn.sigmoid(h @ w_se2 + b_se2).reshape(N, 1, Cexp)

    # -------- pass B: SE scale + project 1x1 (lane-dense interior) ---------
    kern_b = functools.partial(_se_project_kernel, proj_on_mxu=proj_on_mxu)
    w_pr_k = w_pr.astype(jnp.bfloat16) if proj_on_mxu else w_pr

    out_flat = pl.pallas_call(
        kern_b,
        out_shape=jax.ShapeDtypeStruct((N, Ho, Wo * Cout), jnp.float32),
        grid=(N, HT),
        in_specs=[
            pl.BlockSpec((1, TH, Wo, Cexp), lambda n, t: (n, t, 0, 0)),
            pl.BlockSpec((1, 1, Cexp), lambda n, t: (n, 0, 0)),
            pl.BlockSpec((Cexp, Cout), lambda n, t: (0, 0)),
            pl.BlockSpec((1, Cout), lambda n, t: (0, 0)),
        ],
        out_specs=pl.BlockSpec((1, TH, Wo * Cout), lambda n, t: (n, t, 0)),
        compiler_params=cparams,
    )(z, gate, w_pr_k, t_pr)

    # project conv uses padding=1 on a 1x1 conv -> constant (Ho+2, Wo+2) border
    # equal to the folded shift; add it (and the NCHW interface transpose) in one
    # fused XLA pass over the small Cout-wide output.
    interior = jnp.transpose(out_flat.reshape(N, Ho, Wo, Cout), (0, 3, 1, 2))
    border = jnp.broadcast_to(t_pr.reshape(1, Cout, 1, 1),
                              (N, Cout, Ho + 2, Wo + 2))
    return jax.lax.dynamic_update_slice(border, interior, (0, 0, 1, 1))


# ----------------------------------------------------------------------------
# Pure-JAX reference (mirrors the PyTorch module in eval mode), for validation
# ----------------------------------------------------------------------------
def _bn_eval(y, gamma, beta, mean, var):
    inv = gamma / jnp.sqrt(var + EPS)
    return (y - mean[None, :, None, None]) * inv[None, :, None, None] + beta[None, :, None, None]


def _silu(y):
    return y * jax.nn.sigmoid(y)


def reference_forward(x, p, cfg):
    stride, pad = cfg["stride"], cfg["padding"]
    dn = ("NCHW", "OIHW", "NCHW")
    y = jax.lax.conv_general_dilated(x, p["expand"]["w"], (1, 1), "VALID", dimension_numbers=dn)
    y = _silu(_bn_eval(y + p["expand"]["b"][None, :, None, None], *p["expand"]["bn"]))
    Cexp = y.shape[1]
    y = jax.lax.conv_general_dilated(y, p["dw"]["w"], (stride, stride),
                                     [(pad, pad), (pad, pad)], dimension_numbers=dn,
                                     feature_group_count=Cexp)
    y = _silu(_bn_eval(y + p["dw"]["b"][None, :, None, None], *p["dw"]["bn"]))
    pooled = jnp.mean(y, axis=(2, 3), keepdims=True)
    h = jax.lax.conv_general_dilated(pooled, p["se"]["w1"], (1, 1), "VALID", dimension_numbers=dn)
    h = _silu(h + p["se"]["b1"][None, :, None, None])
    s = jax.lax.conv_general_dilated(h, p["se"]["w2"], (1, 1), "VALID", dimension_numbers=dn)
    s = jax.nn.sigmoid(s + p["se"]["b2"][None, :, None, None])
    y = s * y
    y = jax.lax.conv_general_dilated(y, p["proj"]["w"], (1, 1), [(1, 1), (1, 1)],
                                     dimension_numbers=dn)
    y = _bn_eval(y + p["proj"]["b"][None, :, None, None], *p["proj"]["bn"])
    if cfg["use_residual"]:
        y = y + y
    return y


# ----------------------------------------------------------------------------
# Deterministic parameter construction
# ----------------------------------------------------------------------------
def make_params(key, in_channels, out_channels, expand_ratio, ksize, se_ratio=0.25):
    Cexp = in_channels * expand_ratio
    Cse = _make_divisible(in_channels * se_ratio, 8)
    keys = jax.random.split(key, 12)

    def rnd(k, shape, scale=0.2):
        return scale * jax.random.normal(k, shape, jnp.float32)

    def bn(k, c):
        k1, k2, k3, k4 = jax.random.split(k, 4)
        gamma = 1.0 + 0.1 * jax.random.normal(k1, (c,), jnp.float32)
        beta = 0.1 * jax.random.normal(k2, (c,), jnp.float32)
        mean = 0.1 * jax.random.normal(k3, (c,), jnp.float32)
        var = jax.random.uniform(k4, (c,), jnp.float32, 0.5, 1.5)
        return (gamma, beta, mean, var)

    params = {
        "expand": {"w": rnd(keys[0], (Cexp, in_channels, 1, 1)),
                   "b": rnd(keys[1], (Cexp,)),
                   "bn": bn(keys[2], Cexp)},
        "dw": {"w": rnd(keys[3], (Cexp, 1, ksize, ksize)),
               "b": rnd(keys[4], (Cexp,)),
               "bn": bn(keys[5], Cexp)},
        "se": {"w1": rnd(keys[6], (Cse, Cexp, 1, 1)),
               "b1": rnd(keys[7], (Cse,)),
               "w2": rnd(keys[8], (Cexp, Cse, 1, 1)),
               "b2": rnd(keys[9], (Cexp,))},
        "proj": {"w": rnd(keys[10], (out_channels, Cexp, 1, 1)),
                 "b": rnd(keys[11], (out_channels,)),
                 "bn": bn(keys[0], out_channels)},
    }
    return params


if __name__ == "__main__":
    key = jax.random.PRNGKey(0)

    # Config 1: MBConvBlock(4, 4, drop_connect=0.2, expand_ratio=4, k=3, stride=1,
    # padding=1), eval mode.  Exercises the VPU expand/project paths.
    N, Cin, H, W = 2, 4, 16, 16
    Cout, expand_ratio, ksize, stride, padding = 4, 4, 3, 1, 1
    cfg = {"stride": stride, "ksize": ksize, "padding": padding,
           "use_residual": (Cin == Cout and stride == 1)}
    kx, kp = jax.random.split(key)
    x = jax.random.normal(kx, (N, Cin, H, W), jnp.float32)
    params = make_params(kp, Cin, Cout, expand_ratio, ksize)

    ref = jax.block_until_ready(reference_forward(x, params, cfg))
    for tr in (8, None):   # 2 H-tiles/image, then auto (single tile) path
        out = jax.block_until_ready(mbconv_forward(x, params, cfg, tile_rows=tr))
        assert out.shape == ref.shape, (out.shape, ref.shape)
        assert jnp.allclose(out, ref, rtol=2e-2, atol=2e-2), \
            float(jnp.max(jnp.abs(out - ref)))

    # Config 2: wider block (Cin=16 -> Cexp=64) to exercise the bf16 MXU expand
    # and project paths with H-tiling.
    Cin2, Cout2, er2 = 16, 16, 4
    cfg2 = {"stride": 1, "ksize": 3, "padding": 1, "use_residual": True}
    kx2, kp2 = jax.random.split(kp)
    x2 = jax.random.normal(kx2, (N, Cin2, H, W), jnp.float32)
    params2 = make_params(kp2, Cin2, Cout2, er2, 3)
    out2 = jax.block_until_ready(mbconv_forward(x2, params2, cfg2, tile_rows=8))
    ref2 = jax.block_until_ready(reference_forward(x2, params2, cfg2))
    assert out2.shape == ref2.shape, (out2.shape, ref2.shape)
    assert jnp.allclose(out2, ref2, rtol=3e-2, atol=5e-2), \
        float(jnp.max(jnp.abs(out2 - ref2)))

    print("KERNEL_OK")
</pallas_src>

<mosaic_0001>
module attributes {stable_mosaic.version = 11 : i64} {
  func.func @_expand_dw_kernel(%arg0: i32, %arg1: i32, %arg2: memref<1x16x16x4xf32, #tpu.memory_space<vmem>>, %arg3: memref<4x16xf32, #tpu.memory_space<vmem>>, %arg4: memref<1x16xf32, #tpu.memory_space<vmem>>, %arg5: memref<9x16xf32, #tpu.memory_space<vmem>>, %arg6: memref<1x16xf32, #tpu.memory_space<vmem>>, %arg7: memref<1x8x16x16xbf16, #tpu.memory_space<vmem>>, %arg8: memref<1x1x8x16xf32, #tpu.memory_space<vmem>>, %arg9: memref<10x18x16xf32, #tpu.memory_space<vmem>>) attributes {dimension_semantics = [#tpu.dimension_semantics<parallel>, #tpu.dimension_semantics<parallel>], iteration_bounds = array<i64: 2, 2>, scalar_prefetch = 0 : i64, scratch_operands = 1 : i64, tpu.core_type = #tpu.core_type<tc>, window_params = [{transform_indices = @transform_0, window_bounds = array<i64: 1, 16, 16, 4>}, {pipeline_mode = #tpu.pipeline_mode<synchronous>, transform_indices = @transform_1, window_bounds = array<i64: 4, 16>}, {pipeline_mode = #tpu.pipeline_mode<synchronous>, transform_indices = @transform_2, window_bounds = array<i64: 1, 16>}, {pipeline_mode = #tpu.pipeline_mode<synchronous>, transform_indices = @transform_3, window_bounds = array<i64: 9, 16>}, {pipeline_mode = #tpu.pipeline_mode<synchronous>, transform_indices = @transform_4, window_bounds = array<i64: 1, 16>}, {transform_indices = @transform_5, window_bounds = array<i64: 1, 8, 16, 16>}, {transform_indices = @transform_6, window_bounds = array<i64: 1, 1, 8, 16>}]} {
    %cst = arith.constant 0.000000e+00 : f32
    %0 = vector.broadcast %cst : f32 to vector<10x1x16xf32>
    %c0 = arith.constant 0 : index
    %c0_0 = arith.constant 0 : index
    %c0_1 = arith.constant 0 : index
    %1 = vector.load %arg9[%c0, %c0_0, %c0_1] : memref<10x18x16xf32, #tpu.memory_space<vmem>>, vector<10x1x16xf32>
    tpu.vector_store %arg9[%c0, %c0_0, %c0_1], %0 {strides = array<i32>} : memref<10x18x16xf32, #tpu.memory_space<vmem>>, vector<10x1x16xf32>,
    %c0_2 = arith.constant 0 : index
    %c17 = arith.constant 17 : index
    %c0_3 = arith.constant 0 : index
    %2 = vector.load %arg9[%c0_2, %c17, %c0_3] : memref<10x18x16xf32, #tpu.memory_space<vmem>>, vector<10x1x16xf32>
    tpu.vector_store %arg9[%c0_2, %c17, %c0_3], %0 {strides = array<i32>} : memref<10x18x16xf32, #tpu.memory_space<vmem>>, vector<10x1x16xf32>,
    %c0_i32 = arith.constant 0 : i32
    %3 = arith.cmpi eq, %arg1, %c0_i32 : i32
    %4 = arith.extui %3 : i1 to i32
    %c0_i32_4 = arith.constant 0 : i32
    %5 = arith.cmpi ne, %4, %c0_i32_4 : i32
    scf.if %5 {
      %cst_55 = arith.constant 0.000000e+00 : f32
      %93 = vector.broadcast %cst_55 : f32 to vector<1x18x16xf32>
      %c0_56 = arith.constant 0 : index
      %c0_57 = arith.constant 0 : index
      %c0_58 = arith.constant 0 : index
      %94 = vector.load %arg9[%c0_56, %c0_57, %c0_58] : memref<10x18x16xf32, #tpu.memory_space<vmem>>, vector<1x18x16xf32>
      tpu.vector_store %arg9[%c0_56, %c0_57, %c0_58], %93 {strides = array<i32>} : memref<10x18x16xf32, #tpu.memory_space<vmem>>, vector<1x18x16xf32>,
      %c0_59 = arith.constant 0 : index
      %c0_60 = arith.constant 0 : index
      %c0_61 = arith.constant 0 : index
      %c0_62 = arith.constant 0 : index
      %95 = vector.load %arg2[%c0_59, %c0_60, %c0_61, %c0_62] : memref<1x16x16x4xf32, #tpu.memory_space<vmem>>, vector<1x9x16x4xf32>
      %96 = vector.shape_cast %95 : vector<1x9x16x4xf32> to vector<9x16x4xf32>
      %c0_63 = arith.constant 0 : index
      %c0_64 = arith.constant 0 : index
      %97 = vector.load %arg4[%c0_63, %c0_64] : memref<1x16xf32, #tpu.memory_space<vmem>>, vector<1x16xf32>
      %98 = vector.shape_cast %97 : vector<1x16xf32> to vector<1x1x16xf32>
      %99 = vector.shape_cast %98 : vector<1x1x16xf32> to vector<1x1x16xf32>
      %100 = vector.broadcast %99 : vector<1x1x16xf32> to vector<9x16x16xf32>
      %101 = vector.extract_strided_slice %96 {offsets = [0, 0, 0], sizes = [9, 16, 1], strides = [1, 1, 1]} : vector<9x16x4xf32> to vector<9x16x1xf32>
      %c0_65 = arith.constant 0 : index
      %c0_66 = arith.constant 0 : index
      %102 = vector.load %arg3[%c0_65, %c0_66] : memref<4x16xf32, #tpu.memory_space<vmem>>, vector<1x16xf32>
      %103 = vector.shape_cast %102 : vector<1x16xf32> to vector<16xf32>
      %104 = vector.shape_cast %103 : vector<16xf32> to vector<1x1x16xf32>
      %105 = vector.broadcast %101 : vector<9x16x1xf32> to vector<9x16x16xf32>
      %106 = vector.broadcast %104 : vector<1x1x16xf32> to vector<9x16x16xf32>
      %107 = arith.mulf %105, %106 : vector<9x16x16xf32>
      %108 = arith.addf %100, %107 : vector<9x16x16xf32>
      %109 = vector.extract_strided_slice %96 {offsets = [0, 0, 1], sizes = [9, 16, 1], strides = [1, 1, 1]} : vector<9x16x4xf32> to vector<9x16x1xf32>
      %c1_67 = arith.constant 1 : index
      %c0_68 = arith.constant 0 : index
      %110 = vector.load %arg3[%c1_67, %c0_68] : memref<4x16xf32, #tpu.memory_space<vmem>>, vector<1x16xf32>
      %111 = vector.shape_cast %110 : vector<1x16xf32> to vector<16xf32>
      %112 = vector.shape_cast %111 : vector<16xf32> to vector<1x1x16xf32>
      %113 = vector.broadcast %109 : vector<9x16x1xf32> to vector<9x16x16xf32>
      %114 = vector.broadcast %112 : vector<1x1x16xf32> to vector<9x16x16xf32>
      %115 = arith.mulf %113, %114 : vector<9x16x16xf32>
      %116 = arith.addf %108, %115 : vector<9x16x16xf32>
      %117 = vector.extract_strided_slice %96 {offsets = [0, 0, 2], sizes = [9, 16, 1], strides = [1, 1, 1]} : vector<9x16x4xf32> to vector<9x16x1xf32>
      %c2_69 = arith.constant 2 : index
      %c0_70 = arith.constant 0 : index
      %118 = vector.load %arg3[%c2_69, %c0_70] : memref<4x16xf32, #tpu.memory_space<vmem>>, vector<1x16xf32>
      %119 = vector.shape_cast %118 : vector<1x16xf32> to vector<16xf32>
      %120 = vector.shape_cast %119 : vector<16xf32> to vector<1x1x16xf32>
      %121 = vector.broadcast %117 : vector<9x16x1xf32> to vector<9x16x16xf32>
      %122 = vector.broadcast %120 : vector<1x1x16xf32> to vector<9x16x16xf32>
      %123 = arith.mulf %121, %122 : vector<9x16x16xf32>
      %124 = arith.addf %116, %123 : vector<9x16x16xf32>
      %125 = vector.extract_strided_slice %96 {offsets = [0, 0, 3], sizes = [9, 16, 1], strides = [1, 1, 1]} : vector<9x16x4xf32> to vector<9x16x1xf32>
      %c3_71 = arith.constant 3 : index
      %c0_72 = arith.constant 0 : index
      %126 = vector.load %arg3[%c3_71, %c0_72] : memref<4x16xf32, #tpu.memory_space<vmem>>, vector<1x16xf32>
      %127 = vector.shape_cast %126 : vector<1x16xf32> to vector<16xf32>
      %128 = vector.shape_cast %127 : vector<16xf32> to vector<1x1x16xf32>
      %129 = vector.broadcast %125 : vector<9x16x1xf32> to vector<9x16x16xf32>
      %130 = vector.broadcast %128 : vector<1x1x16xf32> to vector<9x16x16xf32>
      %131 = arith.mulf %129, %130 : vector<9x16x16xf32>
      %132 = arith.addf %124, %131 : vector<9x16x16xf32>
      %133 = arith.negf %132 : vector<9x16x16xf32>
      %134 = math.exp %133 : vector<9x16x16xf32>
      %cst_73 = arith.constant 1.000000e+00 : f32
      %135 = vector.broadcast %cst_73 : f32 to vector<9x16x16xf32>
      %136 = arith.addf %135, %134 : vector<9x16x16xf32>
      %137 = arith.divf %135, %136 : vector<9x16x16xf32>
      %138 = arith.mulf %132, %137 : vector<9x16x16xf32>
      %c1_74 = arith.constant 1 : index
      %c1_75 = arith.constant 1 : index
      %c0_76 = arith.constant 0 : index
      %139 = vector.load %arg9[%c1_74, %c1_75, %c0_76] : memref<10x18x16xf32, #tpu.memory_space<vmem>>, vector<9x16x16xf32>
      tpu.vector_store %arg9[%c1_74, %c1_75, %c0_76], %138 {strides = array<i32>} : memref<10x18x16xf32, #tpu.memory_space<vmem>>, vector<9x16x16xf32>,
    } else {
    }
    %c1_i32 = arith.constant 1 : i32
    %6 = arith.cmpi eq, %arg1, %c1_i32 : i32
    %7 = arith.extui %6 : i1 to i32
    %c0_i32_5 = arith.constant 0 : i32
    %8 = arith.cmpi ne, %7, %c0_i32_5 : i32
    scf.if %8 {
      %cst_55 = arith.constant 0.000000e+00 : f32
      %93 = vector.broadcast %cst_55 : f32 to vector<1x18x16xf32>
      %c9 = arith.constant 9 : index
      %c0_56 = arith.constant 0 : index
      %c0_57 = arith.constant 0 : index
      %94 = vector.load %arg9[%c9, %c0_56, %c0_57] : memref<10x18x16xf32, #tpu.memory_space<vmem>>, vector<1x18x16xf32>
      tpu.vector_store %arg9[%c9, %c0_56, %c0_57], %93 {strides = array<i32>} : memref<10x18x16xf32, #tpu.memory_space<vmem>>, vector<1x18x16xf32>,
      %c0_58 = arith.constant 0 : index
      %c7_59 = arith.constant 7 : index
      %c0_60 = arith.constant 0 : index
      %c0_61 = arith.constant 0 : index
      %95 = vector.load %arg2[%c0_58, %c7_59, %c0_60, %c0_61] : memref<1x16x16x4xf32, #tpu.memory_space<vmem>>, vector<1x9x16x4xf32>
      %96 = vector.shape_cast %95 : vector<1x9x16x4xf32> to vector<9x16x4xf32>
      %c0_62 = arith.constant 0 : index
      %c0_63 = arith.constant 0 : index
      %97 = vector.load %arg4[%c0_62, %c0_63] : memref<1x16xf32, #tpu.memory_space<vmem>>, vector<1x16xf32>
      %98 = vector.shape_cast %97 : vector<1x16xf32> to vector<1x1x16xf32>
      %99 = vector.shape_cast %98 : vector<1x1x16xf32> to vector<1x1x16xf32>
      %100 = vector.broadcast %99 : vector<1x1x16xf32> to vector<9x16x16xf32>
      %101 = vector.extract_strided_slice %96 {offsets = [0, 0, 0], sizes = [9, 16, 1], strides = [1, 1, 1]} : vector<9x16x4xf32> to vector<9x16x1xf32>
      %c0_64 = arith.constant 0 : index
      %c0_65 = arith.constant 0 : index
      %102 = vector.load %arg3[%c0_64, %c0_65] : memref<4x16xf32, #tpu.memory_space<vmem>>, vector<1x16xf32>
      %103 = vector.shape_cast %102 : vector<1x16xf32> to vector<16xf32>
      %104 = vector.shape_cast %103 : vector<16xf32> to vector<1x1x16xf32>
      %105 = vector.broadcast %101 : vector<9x16x1xf32> to vector<9x16x16xf32>
      %106 = vector.broadcast %104 : vector<1x1x16xf32> to vector<9x16x16xf32>
      %107 = arith.mulf %105, %106 : vector<9x16x16xf32>
      %108 = arith.addf %100, %107 : vector<9x16x16xf32>
      %109 = vector.extract_strided_slice %96 {offsets = [0, 0, 1], sizes = [9, 16, 1], strides = [1, 1, 1]} : vector<9x16x4xf32> to vector<9x16x1xf32>
      %c1_66 = arith.constant 1 : index
      %c0_67 = arith.constant 0 : index
      %110 = vector.load %arg3[%c1_66, %c0_67] : memref<4x16xf32, #tpu.memory_space<vmem>>, vector<1x16xf32>
      %111 = vector.shape_cast %110 : vector<1x16xf32> to vector<16xf32>
      %112 = vector.shape_cast %111 : vector<16xf32> to vector<1x1x16xf32>
      %113 = vector.broadcast %109 : vector<9x16x1xf32> to vector<9x16x16xf32>
      %114 = vector.broadcast %112 : vector<1x1x16xf32> to vector<9x16x16xf32>
      %115 = arith.mulf %113, %114 : vector<9x16x16xf32>
      %116 = arith.addf %108, %115 : vector<9x16x16xf32>
      %117 = vector.extract_strided_slice %96 {offsets = [0, 0, 2], sizes = [9, 16, 1], strides = [1, 1, 1]} : vector<9x16x4xf32> to vector<9x16x1xf32>
      %c2_68 = arith.constant 2 : index
      %c0_69 = arith.constant 0 : index
      %118 = vector.load %arg3[%c2_68, %c0_69] : memref<4x16xf32, #tpu.memory_space<vmem>>, vector<1x16xf32>
      %119 = vector.shape_cast %118 : vector<1x16xf32> to vector<16xf32>
      %120 = vector.shape_cast %119 : vector<16xf32> to vector<1x1x16xf32>
      %121 = vector.broadcast %117 : vector<9x16x1xf32> to vector<9x16x16xf32>
      %122 = vector.broadcast %120 : vector<1x1x16xf32> to vector<9x16x16xf32>
      %123 = arith.mulf %121, %122 : vector<9x16x16xf32>
      %124 = arith.addf %116, %123 : vector<9x16x16xf32>
      %125 = vector.extract_strided_slice %96 {offsets = [0, 0, 3], sizes = [9, 16, 1], strides = [1, 1, 1]} : vector<9x16x4xf32> to vector<9x16x1xf32>
      %c3_70 = arith.constant 3 : index
      %c0_71 = arith.constant 0 : index
      %126 = vector.load %arg3[%c3_70, %c0_71] : memref<4x16xf32, #tpu.memory_space<vmem>>, vector<1x16xf32>
      %127 = vector.shape_cast %126 : vector<1x16xf32> to vector<16xf32>
      %128 = vector.shape_cast %127 : vector<16xf32> to vector<1x1x16xf32>
      %129 = vector.broadcast %125 : vector<9x16x1xf32> to vector<9x16x16xf32>
      %130 = vector.broadcast %128 : vector<1x1x16xf32> to vector<9x16x16xf32>
      %131 = arith.mulf %129, %130 : vector<9x16x16xf32>
      %132 = arith.addf %124, %131 : vector<9x16x16xf32>
      %133 = arith.negf %132 : vector<9x16x16xf32>
      %134 = math.exp %133 : vector<9x16x16xf32>
      %cst_72 = arith.constant 1.000000e+00 : f32
      %135 = vector.broadcast %cst_72 : f32 to vector<9x16x16xf32>
      %136 = arith.addf %135, %134 : vector<9x16x16xf32>
      %137 = arith.divf %135, %136 : vector<9x16x16xf32>
      %138 = arith.mulf %132, %137 : vector<9x16x16xf32>
      %c0_73 = arith.constant 0 : index
      %c1_74 = arith.constant 1 : index
      %c0_75 = arith.constant 0 : index
      %139 = vector.load %arg9[%c0_73, %c1_74, %c0_75] : memref<10x18x16xf32, #tpu.memory_space<vmem>>, vector<9x16x16xf32>
      tpu.vector_store %arg9[%c0_73, %c1_74, %c0_75], %138 {strides = array<i32>} : memref<10x18x16xf32, #tpu.memory_space<vmem>>, vector<9x16x16xf32>,
    } else {
    }
    %c0_6 = arith.constant 0 : index
    %c0_7 = arith.constant 0 : index
    %9 = vector.load %arg6[%c0_6, %c0_7] : memref<1x16xf32, #tpu.memory_space<vmem>>, vector<1x16xf32>
    %10 = vector.shape_cast %9 : vector<1x16xf32> to vector<1x1x16xf32>
    %11 = vector.shape_cast %10 : vector<1x1x16xf32> to vector<1x1x16xf32>
    %12 = vector.broadcast %11 : vector<1x1x16xf32> to vector<8x16x16xf32>
    %c0_8 = arith.constant 0 : index
    %c0_9 = arith.constant 0 : index
    %c0_10 = arith.constant 0 : index
    %13 = vector.load %arg9[%c0_8, %c0_9, %c0_10] : memref<10x18x16xf32, #tpu.memory_space<vmem>>, vector<8x16x16xf32>
    %c0_11 = arith.constant 0 : index
    %c0_12 = arith.constant 0 : index
    %14 = vector.load %arg5[%c0_11, %c0_12] : memref<9x16xf32, #tpu.memory_space<vmem>>, vector<1x16xf32>
    %15 = vector.shape_cast %14 : vector<1x16xf32> to vector<16xf32>
    %16 = vector.shape_cast %15 : vector<16xf32> to vector<1x1x16xf32>
    %17 = vector.broadcast %16 : vector<1x1x16xf32> to vector<8x16x16xf32>
    %18 = arith.mulf %13, %17 : vector<8x16x16xf32>
    %19 = arith.addf %12, %18 : vector<8x16x16xf32>
    %c0_13 = arith.constant 0 : index
    %c1 = arith.constant 1 : index
    %c0_14 = arith.constant 0 : index
    %20 = vector.load %arg9[%c0_13, %c1, %c0_14] : memref<10x18x16xf32, #tpu.memory_space<vmem>>, vector<8x16x16xf32>
    %c1_15 = arith.constant 1 : index
    %c0_16 = arith.constant 0 : index
    %21 = vector.load %arg5[%c1_15, %c0_16] : memref<9x16xf32, #tpu.memory_space<vmem>>, vector<1x16xf32>
    %22 = vector.shape_cast %21 : vector<1x16xf32> to vector<16xf32>
    %23 = vector.shape_cast %22 : vector<16xf32> to vector<1x1x16xf32>
    %24 = vector.broadcast %23 : vector<1x1x16xf32> to vector<8x16x16xf32>
    %25 = arith.mulf %20, %24 : vector<8x16x16xf32>
    %26 = arith.addf %19, %25 : vector<8x16x16xf32>
    %c0_17 = arith.constant 0 : index
    %c2 = arith.constant 2 : index
    %c0_18 = arith.constant 0 : index
    %27 = vector.load %arg9[%c0_17, %c2, %c0_18] : memref<10x18x16xf32, #tpu.memory_space<vmem>>, vector<8x16x16xf32>
    %c2_19 = arith.constant 2 : index
    %c0_20 = arith.constant 0 : index
    %28 = vector.load %arg5[%c2_19, %c0_20] : memref<9x16xf32, #tpu.memory_space<vmem>>, vector<1x16xf32>
    %29 = vector.shape_cast %28 : vector<1x16xf32> to vector<16xf32>
    %30 = vector.shape_cast %29 : vector<16xf32> to vector<1x1x16xf32>
    %31 = vector.broadcast %30 : vector<1x1x16xf32> to vector<8x16x16xf32>
    %32 = arith.mulf %27, %31 : vector<8x16x16xf32>
    %33 = arith.addf %26, %32 : vector<8x16x16xf32>
    %c1_21 = arith.constant 1 : index
    %c0_22 = arith.constant 0 : index
    %c0_23 = arith.constant 0 : index
    %34 = vector.load %arg9[%c1_21, %c0_22, %c0_23] : memref<10x18x16xf32, #tpu.memory_space<vmem>>, vector<8x16x16xf32>
    %c3 = arith.constant 3 : index
    %c0_24 = arith.constant 0 : index
    %35 = vector.load %arg5[%c3, %c0_24] : memref<9x16xf32, #tpu.memory_space<vmem>>, vector<1x16xf32>
    %36 = vector.shape_cast %35 : vector<1x16xf32> to vector<16xf32>
    %37 = vector.shape_cast %36 : vector<16xf32> to vector<1x1x16xf32>
    %38 = vector.broadcast %37 : vector<1x1x16xf32> to vector<8x16x16xf32>
    %39 = arith.mulf %34, %38 : vector<8x16x16xf32>
    %40 = arith.addf %33, %39 : vector<8x16x16xf32>
    %c1_25 = arith.constant 1 : index
    %c1_26 = arith.constant 1 : index
    %c0_27 = arith.constant 0 : index
    %41 = vector.load %arg9[%c1_25, %c1_26, %c0_27] : memref<10x18x16xf32, #tpu.memory_space<vmem>>, vector<8x16x16xf32>
    %c4 = arith.constant 4 : index
    %c0_28 = arith.constant 0 : index
    %42 = vector.load %arg5[%c4, %c0_28] : memref<9x16xf32, #tpu.memory_space<vmem>>, vector<1x16xf32>
    %43 = vector.shape_cast %42 : vector<1x16xf32> to vector<16xf32>
    %44 = vector.shape_cast %43 : vector<16xf32> to vector<1x1x16xf32>
    %45 = vector.broadcast %44 : vector<1x1x16xf32> to vector<8x16x16xf32>
    %46 = arith.mulf %41, %45 : vector<8x16x16xf32>
    %47 = arith.addf %40, %46 : vector<8x16x16xf32>
    %c1_29 = arith.constant 1 : index
    %c2_30 = arith.constant 2 : index
    %c0_31 = arith.constant 0 : index
    %48 = vector.load %arg9[%c1_29, %c2_30, %c0_31] : memref<10x18x16xf32, #tpu.memory_space<vmem>>, vector<8x16x16xf32>
    %c5 = arith.constant 5 : index
    %c0_32 = arith.constant 0 : index
    %49 = vector.load %arg5[%c5, %c0_32] : memref<9x16xf32, #tpu.memory_space<vmem>>, vector<1x16xf32>
    %50 = vector.shape_cast %49 : vector<1x16xf32> to vector<16xf32>
    %51 = vector.shape_cast %50 : vector<16xf32> to vector<1x1x16xf32>
    %52 = vector.broadcast %51 : vector<1x1x16xf32> to vector<8x16x16xf32>
    %53 = arith.mulf %48, %52 : vector<8x16x16xf32>
    %54 = arith.addf %47, %53 : vector<8x16x16xf32>
    %c2_33 = arith.constant 2 : index
    %c0_34 = arith.constant 0 : index
    %c0_35 = arith.constant 0 : index
    %55 = vector.load %arg9[%c2_33, %c0_34, %c0_35] : memref<10x18x16xf32, #tpu.memory_space<vmem>>, vector<8x16x16xf32>
    %c6 = arith.constant 6 : index
    %c0_36 = arith.constant 0 : index
    %56 = vector.load %arg5[%c6, %c0_36] : memref<9x16xf32, #tpu.memory_space<vmem>>, vector<1x16xf32>
    %57 = vector.shape_cast %56 : vector<1x16xf32> to vector<16xf32>
    %58 = vector.shape_cast %57 : vector<16xf32> to vector<1x1x16xf32>
    %59 = vector.broadcast %58 : vector<1x1x16xf32> to vector<8x16x16xf32>
    %60 = arith.mulf %55, %59 : vector<8x16x16xf32>
    %61 = arith.addf %54, %60 : vector<8x16x16xf32>
    %c2_37 = arith.constant 2 : index
    %c1_38 = arith.constant 1 : index
    %c0_39 = arith.constant 0 : index
    %62 = vector.load %arg9[%c2_37, %c1_38, %c0_39] : memref<10x18x16xf32, #tpu.memory_space<vmem>>, vector<8x16x16xf32>
    %c7 = arith.constant 7 : index
    %c0_40 = arith.constant 0 : index
    %63 = vector.load %arg5[%c7, %c0_40] : memref<9x16xf32, #tpu.memory_space<vmem>>, vector<1x16xf32>
    %64 = vector.shape_cast %63 : vector<1x16xf32> to vector<16xf32>
    %65 = vector.shape_cast %64 : vector<16xf32> to vector<1x1x16xf32>
    %66 = vector.broadcast %65 : vector<1x1x16xf32> to vector<8x16x16xf32>
    %67 = arith.mulf %62, %66 : vector<8x16x16xf32>
    %68 = arith.addf %61, %67 : vector<8x16x16xf32>
    %c2_41 = arith.constant 2 : index
    %c2_42 = arith.constant 2 : index
    %c0_43 = arith.constant 0 : index
    %69 = vector.load %arg9[%c2_41, %c2_42, %c0_43] : memref<10x18x16xf32, #tpu.memory_space<vmem>>, vector<8x16x16xf32>
    %c8 = arith.constant 8 : index
    %c0_44 = arith.constant 0 : index
    %70 = vector.load %arg5[%c8, %c0_44] : memref<9x16xf32, #tpu.memory_space<vmem>>, vector<1x16xf32>
    %71 = vector.shape_cast %70 : vector<1x16xf32> to vector<16xf32>
    %72 = vector.shape_cast %71 : vector<16xf32> to vector<1x1x16xf32>
    %73 = vector.broadcast %72 : vector<1x1x16xf32> to vector<8x16x16xf32>
    %74 = arith.mulf %69, %73 : vector<8x16x16xf32>
    %75 = arith.addf %68, %74 : vector<8x16x16xf32>
    %76 = arith.negf %75 : vector<8x16x16xf32>
    %77 = math.exp %76 : vector<8x16x16xf32>
    %cst_45 = arith.constant 1.000000e+00 : f32
    %78 = vector.broadcast %cst_45 : f32 to vector<8x16x16xf32>
    %79 = arith.addf %78, %77 : vector<8x16x16xf32>
    %80 = arith.divf %78, %79 : vector<8x16x16xf32>
    %81 = arith.mulf %75, %80 : vector<8x16x16xf32>
    %82 = arith.truncf %81 : vector<8x16x16xf32> to vector<8x16x16xbf16>
    %c0_46 = arith.constant 0 : index
    %c0_47 = arith.constant 0 : index
    %c0_48 = arith.constant 0 : index
    %c0_49 = arith.constant 0 : index
    %83 = vector.load %arg7[%c0_46, %c0_47, %c0_48, %c0_49] : memref<1x8x16x16xbf16, #tpu.memory_space<vmem>>, vector<1x8x16x16xbf16>
    %84 = vector.shape_cast %83 : vector<1x8x16x16xbf16> to vector<8x16x16xbf16>
    %85 = vector.shape_cast %82 : vector<8x16x16xbf16> to vector<1x8x16x16xbf16>
    tpu.vector_store %arg7[%c0_46, %c0_47, %c0_48, %c0_49], %85 {strides = array<i32>} : memref<1x8x16x16xbf16, #tpu.memory_space<vmem>>, vector<1x8x16x16xbf16>,
    %cst_50 = arith.constant dense<0.000000e+00> : vector<16xf32>
    %86 = vector.multi_reduction <add>, %81, %cst_50 [0, 1] : vector<8x16x16xf32> to vector<16xf32>
    %87 = vector.shape_cast %86 : vector<16xf32> to vector<1x16xf32>
    %88 = vector.shape_cast %87 : vector<1x16xf32> to vector<1x16xf32>
    %89 = vector.broadcast %88 : vector<1x16xf32> to vector<8x16xf32>
    %c0_51 = arith.constant 0 : index
    %c0_52 = arith.constant 0 : index
    %c0_53 = arith.constant 0 : index
    %c0_54 = arith.constant 0 : index
    %90 = vector.load %arg8[%c0_51, %c0_52, %c0_53, %c0_54] : memref<1x1x8x16xf32, #tpu.memory_space<vmem>>, vector<1x1x8x16xf32>
    %91 = vector.shape_cast %90 : vector<1x1x8x16xf32> to vector<8x16xf32>
    %92 = vector.shape_cast %89 : vector<8x16xf32> to vector<1x1x8x16xf32>
    tpu.vector_store %arg8[%c0_51, %c0_52, %c0_53, %c0_54], %92 {strides = array<i32>} : memref<1x1x8x16xf32, #tpu.memory_space<vmem>>, vector<1x1x8x16xf32>,
    return
  }
  func.func @transform_0(%arg0: i32, %arg1: i32) -> (i32, i32, i32, i32) {
    %c0_i32 = arith.constant 0 : i32
    %c0_i32_0 = arith.constant 0 : i32
    %c0_i32_1 = arith.constant 0 : i32
    %c0_i32_2 = arith.constant 0 : i32
    return %arg0, %c0_i32, %c0_i32_0, %c0_i32_1 : i32, i32, i32, i32
  }
  func.func @transform_1(%arg0: i32, %arg1: i32) -> (i32, i32) {
    %c0_i32 = arith.constant 0 : i32
    %c0_i32_0 = arith.constant 0 : i32
    %c0_i32_1 = arith.constant 0 : i32
    return %c0_i32, %c0_i32_0 : i32, i32
  }
  func.func @transform_2(%arg0: i32, %arg1: i32) -> (i32, i32) {
    %c0_i32 = arith.constant 0 : i32
    %c0_i32_0 = arith.constant 0 : i32
    %c0_i32_1 = arith.constant 0 : i32
    return %c0_i32, %c0_i32_0 : i32, i32
  }
  func.func @transform_3(%arg0: i32, %arg1: i32) -> (i32, i32) {
    %c0_i32 = arith.constant 0 : i32
    %c0_i32_0 = arith.constant 0 : i32
    %c0_i32_1 = arith.constant 0 : i32
    return %c0_i32, %c0_i32_0 : i32, i32
  }
  func.func @transform_4(%arg0: i32, %arg1: i32) -> (i32, i32) {
    %c0_i32 = arith.constant 0 : i32
    %c0_i32_0 = arith.constant 0 : i32
    %c0_i32_1 = arith.constant 0 : i32
    return %c0_i32, %c0_i32_0 : i32, i32
  }
  func.func @transform_5(%arg0: i32, %arg1: i32) -> (i32, i32, i32, i32) {
    %c0_i32 = arith.constant 0 : i32
    %c0_i32_0 = arith.constant 0 : i32
    %c0_i32_1 = arith.constant 0 : i32
    return %arg0, %arg1, %c0_i32, %c0_i32_0 : i32, i32, i32, i32
  }
  func.func @transform_6(%arg0: i32, %arg1: i32) -> (i32, i32, i32, i32) {
    %c0_i32 = arith.constant 0 : i32
    %c0_i32_0 = arith.constant 0 : i32
    %c0_i32_1 = arith.constant 0 : i32
    return %arg0, %arg1, %c0_i32, %c0_i32_0 : i32, i32, i32, i32
  }
}

</mosaic_0001>

<bundles_post_ra>
// kernel: tpu_custom_call.1
= control target key start
LH: loop header
LB: loop body
LE: loop exit
PB: predicated region body
PF: predicated region fallthrough
CT: control target
= control target key end

     0   :  { %s4657_s0 = inlined_call_operand.vmem [shape: f32[2,16,16,4], index: 0, kind: input, shape index: {}]   ;;  %s4658_s1 = inlined_call_operand.vmem [shape: f32[4,16], index: 1, kind: input, shape index: {}]   ;;  %s4659_s2 = inlined_call_operand.vmem [shape: f32[1,16], index: 2, kind: input, shape index: {}]   ;;  %s4660_s3 = inlined_call_operand.vmem [shape: f32[9,16], index: 3, kind: input, shape index: {}]   ;;  %s4661_s4 = inlined_call_operand.vmem [shape: f32[1,16], index: 4, kind: input, shape index: {}]   ;;  %s4662_s5 = inlined_call_operand.hbm [shape: bf16[2,16,16,16], index: 5, kind: output, shape index: {0}]   ;;  %s4663_s6 = inlined_call_operand.hbm [shape: f32[2,2,8,16], index: 6, kind: output, shape index: {1}]  }
   0x1   :  { %4664 = sst [smem:[#allocation9_spill]] %s4657_s0 }
   0x2   :  { %4665 = sst [smem:[#allocation10_spill]] %s4658_s1 }
   0x3   :  { %4666 = sst [smem:[#allocation11_spill]] %s4659_s2 }
   0x4   :  { %12 = vsyncpa [#allocation4], 0 }
   0x5   :  { %14 = vsyncpa [#allocation4 + $0x1], 0 }
   0x6   :  { %15 = vsyncpa [#allocation6], 0 }
   0x7   :  { %17 = vsyncpa [#allocation6 + $0x1], 0  ;;  %s3099_s21 = smov 0   ;;  %s3101_s22 = smov 0  }
   0x8   :  { %s3103_s23 = smov 0   ;;  %s3105_s24 = smov 0  }
   0x9   :  { %s3107_s25 = smov 0   ;;  %s3109_s26 = smov 0  }
   0xa   :  { %s3111_s27 = smov 0   ;;  %s3113_s28 = smov 0  }
   0xb LB: > { %s2463_s29 = sadd.s32 4294967295, %s3047_s28   ;;  %s2464_s30 = sadd.s32 4294967294, %s3047_s28   ;;  %s3047_s28 = sphi %s3113_s28, %s23_s28   ;;  %s3043_s27 = sphi %s3111_s27, %s4681_s27   ;;  %s3039_s26 = sphi %s3109_s26, %s4680_s26   ;;  %s3035_s25 = sphi %s3107_s25, %s4679_s25   ;;  %s3031_s24 = sphi %s3105_s24, %s4678_s24   ;;  %s3027_s23 = sphi %s3103_s23, %s4677_s23   ;;  %s3023_s22 = sphi %s3101_s22, %s4676_s22   ;;  %s3019_s21 = sphi %s3099_s21, %s4675_s21  }
   0xc   : > { %s32_s7 = sadd.s32 1, %s3039_s26  ;;  %s35_s8 = sadd.s32 1, %s3043_s27 }
   0xd   : > { %p33_p0 = scmp.ge.s32.totalorder %s32_s7, 2  ;;  %p164_p1 = scmp.ne.s32.totalorder %s3027_s23, %s3023_s22 }
   0xe   : > { %p165_p2 = scmp.eq.s32.totalorder %s2463_s29, 3  ;;  %p170_p5 = scmp.ne.s32.totalorder %s3023_s22, %s3019_s21 }
   0xf   : > { %s4683_s7 = smov (%p33_p0, %s32_s7), 0  ;;  %s4685_s8 = smov (!%p33_p0, %s35_s8), %s3043_s27 }
  0x10   : > { %s150_s9 = ssub.s32 %s3039_s26, %s4683_s7  ;;  %p3150_p3 = por %p165_p2, %p164_p1 }
  0x11   : > { %p37_p4 = scmp.ge.s32.totalorder %s4685_s8, 2  ;;  %p171_p6 = scmp.eq.s32.totalorder %s2464_s30, 3 }
  0x12   : > { %p2467_p7 = scmp.ge.s32.totalorder %s3047_s28, 1  ;;  %p237_p9 = scmp.lt.s32.totalorder %s3047_s28, 5 }
  0x13   : > { %s4687_s8 = smov (%p37_p4, %s4685_s8), 0  ;;  %p3159_p8 = por %p171_p6, %p170_p5 }
  0x14   : > { %s149_s12 = ssub.s32 %s3043_s27, %s4687_s8  ;;  %s154_s13 = sadd.s32 1, %s3027_s23 }
  0x15   : > { %s151_s14 = sor.u32 %s150_s9, %s149_s12  ;;  %p238_p10 = pnand %p2467_p7, %p237_p9 }
  0x16   : > { %p152_p11 = scmp.eq.s32.totalorder %s151_s14, 0  ;;  %s3171_s16 = sand.u32 (!%p238_p10), 1, %s3023_s22   ;;  %vm278_vm0 = vcmask (!%p238_p10), 122880   ;;  %v3049_v0 = vmov (!%p238_p10), 0.0  }
  0x17   : > { %241 = sbr.rel (%p238_p10) target bundleno = 831 (0x33f), region = 40  ;;  %p272_p12 = scmp.lt.s32.totalorder (!%p238_p10), %s3035_s25, 1  ;;  %279 = vst.msk [vmem:[#allocation2] sm:$0x1] (!%p238_p10), %vm278_vm0, %v3049_v0  ;;  %280 = vst.msk [vmem:[#allocation2 + $0x18] sm:$0x1] (!%p238_p10), %vm278_vm0, %v3049_v0 }
  0x18   : > { %s3168_s15 = scalar_select %p152_p11, %s3027_s23, %s154_s13  }
  0x19   : > { %s2468_s17 = sshll.u32 (!%p238_p10), %s3171_s16, 6  ;;  %s2469_s18 = sshll.u32 (!%p238_p10), %s3171_s16, 3  ;;  %281 = vst.msk [vmem:[#allocation2 + $0x30] sm:$0x1] (!%p238_p10), %vm278_vm0, %v3049_v0  ;;  %282 = vst.msk [vmem:[#allocation2 + $0x48] sm:$0x1] (!%p238_p10), %vm278_vm0, %v3049_v0 }
  0x1a   : > { %283 = vst.msk [vmem:[#allocation2 + $0x60] sm:$0x1] (!%p238_p10), %vm278_vm0, %v3049_v0  ;;  %284 = vst.msk [vmem:[#allocation2 + $0x78] sm:$0x1] (!%p238_p10), %vm278_vm0, %v3049_v0  ;;  %s4669_s0 = sld [smem:[#allocation9_spill]] (!%p238_p10)  ;;  %s3204_s12 = scalar_lea.vmem (!%p238_p10), [#allocation3], %s2468_s17 }
  0x1b   : > { %285 = vst.msk [vmem:[#allocation2 + $0x90] sm:$0x1] (!%p238_p10), %vm278_vm0, %v3049_v0  ;;  %286 = vst.msk [vmem:[#allocation2 + $0xa8] sm:$0x1] (!%p238_p10), %vm278_vm0, %v3049_v0  ;;  %s3206_s13 = scalar_lea.vmem (!%p238_p10), [#allocation5], %s2469_s18  ;;  %p2472_p13 = scmp.ne.s32.totalorder (!%p238_p10), %s3031_s24, 0 }
  0x1c   : > { %287 = vst.msk [vmem:[#allocation2 + $0xc0] sm:$0x1] (!%p238_p10), %vm278_vm0, %v3049_v0  ;;  %288 = vst.msk [vmem:[#allocation2 + $0xd8] sm:$0x1] (!%p238_p10), %vm278_vm0, %v3049_v0 }
  0x1d   : > { %289 = vst.msk [vmem:[#allocation2 + $0x11] sm:$0x1] (!%p238_p10), %vm278_vm0, %v3049_v0  ;;  %290 = vst.msk [vmem:[#allocation2 + $0x29] sm:$0x1] (!%p238_p10), %vm278_vm0, %v3049_v0 }
  0x1e   : > { %291 = vst.msk [vmem:[#allocation2 + $0x41] sm:$0x1] %vm278_vm0, %v3049_v0  ;;  %292 = vst.msk [vmem:[#allocation2 + $0x59] sm:$0x1] %vm278_vm0, %v3049_v0  ;;  %s273_s19 = scalar_select %p272_p12, %s3035_s25, 1 }
  0x1f   : > { %293 = vst.msk [vmem:[#allocation2 + $0x71] sm:$0x1] %vm278_vm0, %v3049_v0  ;;  %294 = vst.msk [vmem:[#allocation2 + $0x89] sm:$0x1] %vm278_vm0, %v3049_v0  ;;  %302 = sbr.rel (%p2472_p13) target bundleno = 343 (0x157), region = 44  ;;  %v3050_v3 = vmov (!%p2472_p13), 0  }
  0x20   : > { %295 = vst.msk [vmem:[#allocation2 + $0xa1] sm:$0x1] %vm278_vm0, %v3049_v0  ;;  %296 = vst.msk [vmem:[#allocation2 + $0xb9] sm:$0x1] %vm278_vm0, %v3049_v0  ;;  %s2590_s20 = sshll.u32 %s273_s19, 8  ;;  %2698 = vset.pattern.permute.xlu1 (!%p2472_p13), %v3050_v3  ;;  %2697 = vset.pattern.permute.xlu0 (!%p2472_p13), %v3050_v3  ;;  %v3051_v20 = vmov (!%p2472_p13), 1  }
  0x21   : > { %297 = vst.msk [vmem:[#allocation2 + $0xd1] sm:$0x1] %vm278_vm0, %v3049_v0  ;;  %298 = vst.msk [vmem:[#allocation2 + $0xe9] sm:$0x1] %vm278_vm0, %v3049_v0  ;;  %s3202_s9 = scalar_lea.vmem %s4669_s0, %s2590_s20  ;;  %v3052_v21 = vmov (!%p2472_p13), 2   ;;  %v3053_v22 = vmov (!%p2472_p13), 3  }
  0x22   : > { %v3210_v1 = vld [vmem:[%s3202_s9 + $0x10] sm:$0xff] (!%p2472_p13)  ;;  %v3213_v2 = vld [vmem:[%s3202_s9] sm:$0xff] (!%p2472_p13)  ;;  %v3218_v4 = vld [vmem:[%s3202_s9 + $0x18] sm:$0xff] (!%p2472_p13)  ;;  %vm303_vm1 = vcmask (!%p2472_p13), 130048   ;;  %vm306_vm2 = vcmask (!%p2472_p13), 123904   ;;  %v3054_v23 = vmov (!%p2472_p13), 0.0  }
  0x23   : > { %346 = vperm.xlu1 (!%p2472_p13), %2698, %v3210_v1   ;;  %336 = vperm.xlu0 (!%p2472_p13), %2697, %v3213_v2   ;;  %v3221_v5 = vld [vmem:[%s3202_s9 + $0x8] sm:$0xff] (!%p2472_p13)  ;;  %v3229_v7 = vld [vmem:[%s3202_s9 + $0x20] sm:$0xff] (!%p2472_p13)  ;;  %v3234_v8 = vld [vmem:[%s3202_s9 + $0x38] sm:$0xff] (!%p2472_p13)  ;;  %304 = vst.msk [vmem:[#allocation2] sm:$0xff] (!%p2472_p13), %vm303_vm1, %v3054_v23  ;;  %s4670_s1 = sld [smem:[#allocation10_spill]] (!%p2472_p13)  ;;  %s4671_s2 = sld [smem:[#allocation11_spill]] (!%p2472_p13) }
  0x24   : > { %v3226_v6 = vld [vmem:[%s3202_s9 + $0x28] sm:$0xff] (!%p2472_p13)  ;;  %v3237_v9 = vld [vmem:[%s3202_s9 + $0x30] sm:$0xff] (!%p2472_p13)  ;;  %v3245_v11 = vld [vmem:[%s3202_s9 + $0x40] sm:$0xff] (!%p2472_p13)  ;;  %305 = vst.msk [vmem:[#allocation2 + $0x8] sm:$0xff] (!%p2472_p13), %vm303_vm1, %v3054_v23 }
  0x25   : > { %v3242_v10 = vld [vmem:[%s3202_s9 + $0x48] sm:$0xff] (!%p2472_p13)  ;;  %v3250_v12 = vld [vmem:[%s3202_s9 + $0x58] sm:$0xff] (!%p2472_p13)  ;;  %v3253_v13 = vld [vmem:[%s3202_s9 + $0x50] sm:$0xff] (!%p2472_p13)  ;;  %307 = vst.msk [vmem:[#allocation2 + $0x10] sm:$0x3] (!%p2472_p13), %vm306_vm2, %v3054_v23 }
  0x26   : > { %v3258_v14 = vld [vmem:[%s3202_s9 + $0x68] sm:$0xff]  ;;  %v3261_v15 = vld [vmem:[%s3202_s9 + $0x60] sm:$0xff]  ;;  %v3266_v16 = vld [vmem:[%s3202_s9 + $0x78] sm:$0xff] }
  0x27   : > { %351 = vperm.xlu1 %2698, %v3218_v4   ;;  %341 = vperm.xlu0 %2697, %v3221_v5   ;;  %v3269_v17 = vld [vmem:[%s3202_s9 + $0x70] sm:$0xff]  ;;  %v3274_v18 = vld [vmem:[%s3202_s9 + $0x88] sm:$0xff]  ;;  %v3277_v19 = vld [vmem:[%s3202_s9 + $0x80] sm:$0xff] }
  0x29   : > { %v3352_v42 = vld [vmem:[%s4670_s1] ss:$0 sm:$0xff]  ;;  %v3359_v45 = vld [vmem:[%s4670_s1 + $0x1] ss:$0 sm:$0xff] }
  0x2a   : > { %v3364_v46 = vld [vmem:[%s4671_s2] ss:$0 sm:$0xff] }
  0x2b   : > { %361 = vperm.xlu1 %2698, %v3226_v6   ;;  %356 = vperm.xlu0 %2697, %v3229_v7  }
  0x2f   : > { %371 = vperm.xlu1 %2698, %v3234_v8   ;;  %366 = vperm.xlu0 %2697, %v3237_v9  }
  0x33   : > { %381 = vperm.xlu1 %2698, %v3242_v10   ;;  %376 = vperm.xlu0 %2697, %v3245_v11  }
  0x37   : > { %391 = vperm.xlu1 %2698, %v3250_v12   ;;  %386 = vperm.xlu0 %2697, %v3253_v13  }
  0x3b   : > { %401 = vperm.xlu1 %2698, %v3258_v14   ;;  %396 = vperm.xlu0 %2697, %v3261_v15  }
  0x3f   : > { %411 = vperm.xlu1 %2698, %v3266_v16   ;;  %406 = vperm.xlu0 %2697, %v3269_v17  }
  0x43   : > { %421 = vperm.xlu1 %2698, %v3274_v18   ;;  %416 = vperm.xlu0 %2697, %v3277_v19  }
  0x47   : > { %2700 = vset.pattern.permute.xlu1 %v3051_v20  ;;  %2699 = vset.pattern.permute.xlu0 %v3051_v20 }
  0x48   : > { %470 = vperm.xlu1 %2700, %v3221_v5   ;;  %466 = vperm.xlu0 %2699, %v3213_v2  }
  0x4c   : > { %474 = vperm.xlu1 %2700, %v3210_v1   ;;  %478 = vperm.xlu0 %2699, %v3218_v4  }
  0x50   : > { %482 = vperm.xlu1 %2700, %v3229_v7   ;;  %486 = vperm.xlu0 %2699, %v3226_v6  }
  0x54   : > { %490 = vperm.xlu1 %2700, %v3237_v9   ;;  %494 = vperm.xlu0 %2699, %v3234_v8  }
  0x58   : > { %498 = vperm.xlu1 %2700, %v3245_v11   ;;  %502 = vperm.xlu0 %2699, %v3242_v10  }
  0x5c   : > { %506 = vperm.xlu1 %2700, %v3253_v13   ;;  %510 = vperm.xlu0 %2699, %v3250_v12  }
  0x60   : > { %514 = vperm.xlu1 %2700, %v3261_v15   ;;  %518 = vperm.xlu0 %2699, %v3258_v14  }
  0x64   : > { %522 = vperm.xlu1 %2700, %v3269_v17   ;;  %526 = vperm.xlu0 %2699, %v3266_v16  }
  0x68   : > { %530 = vperm.xlu1 %2700, %v3277_v19   ;;  %534 = vperm.xlu0 %2699, %v3274_v18  }
  0x6c   : > { %2701 = vset.pattern.permute.xlu1 %v3052_v21  ;;  %2702 = vset.pattern.permute.xlu0 %v3052_v21 }
  0x6d   : > { %579 = vperm.xlu1 %2701, %v3213_v2   ;;  %583 = vperm.xlu0 %2702, %v3221_v5  }
  0x71   : > { %587 = vperm.xlu1 %2701, %v3210_v1   ;;  %595 = vperm.xlu0 %2702, %v3229_v7  }
  0x75   : > { %591 = vperm.xlu1 %2701, %v3218_v4   ;;  %603 = vperm.xlu0 %2702, %v3237_v9  }
  0x79   : > { %599 = vperm.xlu1 %2701, %v3226_v6   ;;  %611 = vperm.xlu0 %2702, %v3245_v11  }
  0x7d   : > { %607 = vperm.xlu1 %2701, %v3234_v8   ;;  %619 = vperm.xlu0 %2702, %v3253_v13  }
  0x81   : > { %615 = vperm.xlu1 %2701, %v3242_v10   ;;  %627 = vperm.xlu0 %2702, %v3261_v15  }
  0x85   : > { %623 = vperm.xlu1 %2701, %v3250_v12   ;;  %635 = vperm.xlu0 %2702, %v3269_v17  }
  0x89   : > { %631 = vperm.xlu1 %2701, %v3258_v14   ;;  %643 = vperm.xlu0 %2702, %v3277_v19  }
  0x8d   : > { %639 = vperm.xlu1 %2701, %v3266_v16   ;;  %2703 = vset.pattern.permute.xlu0 %v3053_v22 }
  0x8e   : > { %692 = vperm.xlu0 %2703, %v3213_v2  }
  0x91   : > { %647 = vperm.xlu1 %2701, %v3274_v18  }
  0x92   : > { %704 = vperm.xlu0 %2703, %v3218_v4  }
  0x95   : > { %2704 = vset.pattern.permute.xlu1 %v3053_v22 }
  0x96   : > { %696 = vperm.xlu1 %2704, %v3221_v5   ;;  %712 = vperm.xlu0 %2703, %v3226_v6  }
  0x9a   : > { %700 = vperm.xlu1 %2704, %v3210_v1   ;;  %720 = vperm.xlu0 %2703, %v3234_v8  }
  0x9e   : > { %708 = vperm.xlu1 %2704, %v3229_v7   ;;  %728 = vperm.xlu0 %2703, %v3242_v10  }
  0xa2   : > { %v347_v24 = vpop.permute.xlu1 %346  ;;  %716 = vperm.xlu1 %2704, %v3237_v9   ;;  %736 = vperm.xlu0 %2703, %v3250_v12   ;;  %v337_v25 = vpop.permute.xlu0 %336 }
  0xa3   : > { %v428_v43 = vmul.f32 %v3352_v42, %v337_v25  ;;  %v430_v47 = vmul.f32 %v3352_v42, %v347_v24 }
  0xa5   : > { %v446_v51 = vadd.f32 %v3364_v46, %v428_v43  ;;  %v448_v57 = vadd.f32 %v3364_v46, %v430_v47 }
  0xa6   : > { %v352_v26 = vpop.permute.xlu1 %351  ;;  %724 = vperm.xlu1 %2704, %v3245_v11   ;;  %744 = vperm.xlu0 %2703, %v3258_v14   ;;  %v342_v27 = vpop.permute.xlu0 %341 }
  0xa7   : > { %v429_v44 = vmul.f32 %v3352_v42, %v342_v27  ;;  %v431_v48 = vmul.f32 %v3352_v42, %v352_v26 }
  0xa9   : > { %v447_v52 = vadd.f32 %v3364_v46, %v429_v44  ;;  %v449_v58 = vadd.f32 %v3364_v46, %v431_v48 }
  0xaa   : > { %v362_v28 = vpop.permute.xlu1 %361  ;;  %732 = vperm.xlu1 %2704, %v3253_v13   ;;  %752 = vperm.xlu0 %2703, %v3266_v16   ;;  %v357_v29 = vpop.permute.xlu0 %356 }
  0xab   : > { %v433_v61 = vmul.f32 %v3352_v42, %v362_v28  ;;  %v432_v62 = vmul.f32 %v3352_v42, %v357_v29 }
  0xad   : > { %v451_v7 = vadd.f32 %v3364_v46, %v433_v61  ;;  %v450_v8 = vadd.f32 %v3364_v46, %v432_v62 }
  0xae   : > { %v372_v30 = vpop.permute.xlu1 %371  ;;  %740 = vperm.xlu1 %2704, %v3261_v15   ;;  %760 = vperm.xlu0 %2703, %v3274_v18   ;;  %v367_v31 = vpop.permute.xlu0 %366 }
  0xaf   : > { %v435_v3 = vmul.f32 %v3352_v42, %v372_v30  ;;  %v434_v4 = vmul.f32 %v3352_v42, %v367_v31 }
  0xb1   : > { %v453_v13 = vadd.f32 %v3364_v46, %v435_v3  ;;  %v452_v14 = vadd.f32 %v3364_v46, %v434_v4 }
  0xb2   : > { %v382_v32 = vpop.permute.xlu1 %381  ;;  %748 = vperm.xlu1 %2704, %v3269_v17   ;;  %v377_v33 = vpop.permute.xlu0 %376 }
  0xb3   : > { %v437_v17 = vmul.f32 %v3352_v42, %v382_v32  ;;  %v436_v18 = vmul.f32 %v3352_v42, %v377_v33 }
  0xb5   : > { %v455_v27 = vadd.f32 %v3364_v46, %v437_v17  ;;  %v454_v28 = vadd.f32 %v3364_v46, %v436_v18 }
  0xb6   : > { %v392_v34 = vpop.permute.xlu1 %391  ;;  %756 = vperm.xlu1 %2704, %v3277_v19   ;;  %v387_v35 = vpop.permute.xlu0 %386 }
  0xb7   : > { %v439_v23 = vmul.f32 %v3352_v42, %v392_v34  ;;  %v438_v24 = vmul.f32 %v3352_v42, %v387_v35 }
  0xb9   : > { %v457_v33 = vadd.f32 %v3364_v46, %v439_v23  ;;  %v456_v34 = vadd.f32 %v3364_v46, %v438_v24 }
  0xba   : > { %v3337_v36 = vpop.permute.xlu1 %401  ;;  %v3339_v37 = vpop.permute.xlu0 %396 }
  0xbb   : > { %v441_v44 = vmul.f32 %v3352_v42, %v3337_v36  ;;  %v440_v47 = vmul.f32 %v3352_v42, %v3339_v37 }
  0xbd   : > { %v459_v36 = vadd.f32 %v3364_v46, %v441_v44  ;;  %v458_v37 = vadd.f32 %v3364_v46, %v440_v47 }
  0xbe   : > { %v3341_v38 = vpop.permute.xlu1 %411  ;;  %v3343_v39 = vpop.permute.xlu0 %406 }
  0xc2   : > { %v3345_v40 = vpop.permute.xlu1 %421  ;;  %v3347_v41 = vpop.permute.xlu0 %416 }
  0xc3   : > { %v444_v3 = vmul.f32 %v3352_v42, %v3347_v41 }
  0xc7   : > { %v471_v49 = vpop.permute.xlu1 %470  ;;  %v467_v50 = vpop.permute.xlu0 %466 }
  0xc8   : > { %v542_v53 = vmul.f32 %v3359_v45, %v471_v49  ;;  %v541_v54 = vmul.f32 %v3359_v45, %v467_v50 }
  0xca   : > { %v3372_v55 = vadd.f32 %v542_v53, %v447_v52  ;;  %v3374_v56 = vadd.f32 %v541_v54, %v446_v51  ;;  %v443_v52 = vmul.f32 %v3352_v42, %v3341_v38  ;;  %v442_v53 = vmul.f32 %v3352_v42, %v3343_v39 }
  0xcb   : > { %v475_v59 = vpop.permute.xlu1 %474  ;;  %v479_v60 = vpop.permute.xlu0 %478 }
  0xcc   : > { %v543_v63 = vmul.f32 %v3359_v45, %v475_v59  ;;  %v544_v0 = vmul.f32 %v3359_v45, %v479_v60  ;;  %v461_v62 = vadd.f32 %v3364_v46, %v443_v52  ;;  %v460_v38 = vadd.f32 %v3364_v46, %v442_v53 }
  0xce   : > { %v3382_v1 = vadd.f32 %v543_v63, %v448_v57  ;;  %v3384_v2 = vadd.f32 %v544_v0, %v449_v58  ;;  %v445_v0 = vmul.f32 %v3352_v42, %v3345_v40 }
  0xcf   : > { %v483_v5 = vpop.permute.xlu1 %482  ;;  %v487_v6 = vpop.permute.xlu0 %486 }
  0xd0   : > { %v545_v9 = vmul.f32 %v3359_v45, %v483_v5  ;;  %v546_v10 = vmul.f32 %v3359_v45, %v487_v6 }
  0xd2   : > { %v3392_v11 = vadd.f32 %v545_v9, %v450_v8  ;;  %v3394_v12 = vadd.f32 %v546_v10, %v451_v7  ;;  %v463_v10 = vadd.f32 %v3364_v46, %v445_v0 }
  0xd3   : > { %v491_v15 = vpop.permute.xlu1 %490  ;;  %v495_v16 = vpop.permute.xlu0 %494 }
  0xd4   : > { %v547_v19 = vmul.f32 %v3359_v45, %v491_v15  ;;  %v548_v20 = vmul.f32 %v3359_v45, %v495_v16 }
  0xd6   : > { %v3402_v21 = vadd.f32 %v547_v19, %v452_v14  ;;  %v3404_v22 = vadd.f32 %v548_v20, %v453_v13  ;;  %v462_v13 = vadd.f32 %v3364_v46, %v444_v3 }
  0xd7   : > { %v499_v25 = vpop.permute.xlu1 %498  ;;  %v503_v26 = vpop.permute.xlu0 %502 }
  0xd8   : > { %v549_v29 = vmul.f32 %v3359_v45, %v499_v25  ;;  %v550_v30 = vmul.f32 %v3359_v45, %v503_v26 }
  0xda   : > { %v3412_v31 = vadd.f32 %v549_v29, %v454_v28  ;;  %v3414_v32 = vadd.f32 %v550_v30, %v455_v27  ;;  %v3471_v29 = vld [vmem:[%s4670_s1 + $0x2] ss:$0 sm:$0xff] }
  0xdb   : > { %v507_v43 = vpop.permute.xlu1 %506  ;;  %v511_v35 = vpop.permute.xlu0 %510 }
  0xdc   : > { %v551_v48 = vmul.f32 %v3359_v45, %v507_v43  ;;  %v552_v49 = vmul.f32 %v3359_v45, %v511_v35  ;;  %v3479_v43 = vld [vmem:[%s4670_s1 + $0x3] ss:$0 sm:$0xff] }
  0xde   : > { %v3424_v50 = vadd.f32 %v551_v48, %v456_v34  ;;  %v3426_v51 = vadd.f32 %v552_v49, %v457_v33 }
  0xdf   : > { %v515_v54 = vpop.permute.xlu1 %514  ;;  %v519_v57 = vpop.permute.xlu0 %518 }
  0xe0   : > { %v553_v58 = vmul.f32 %v3359_v45, %v515_v54  ;;  %v554_v59 = vmul.f32 %v3359_v45, %v519_v57 }
  0xe2   : > { %v3436_v60 = vadd.f32 %v553_v58, %v458_v37  ;;  %v3438_v61 = vadd.f32 %v554_v59, %v459_v36 }
  0xe3   : > { %v523_v63 = vpop.permute.xlu1 %522  ;;  %v527_v39 = vpop.permute.xlu0 %526 }
  0xe4   : > { %v555_v4 = vmul.f32 %v3359_v45, %v523_v63  ;;  %v556_v5 = vmul.f32 %v3359_v45, %v527_v39 }
  0xe6   : > { %v3448_v6 = vadd.f32 %v555_v4, %v460_v38  ;;  %v3450_v7 = vadd.f32 %v556_v5, %v461_v62 }
  0xe7   : > { %v531_v8 = vpop.permute.xlu1 %530  ;;  %v535_v9 = vpop.permute.xlu0 %534 }
  0xe8   : > { %v557_v14 = vmul.f32 %v3359_v45, %v531_v8  ;;  %v558_v40 = vmul.f32 %v3359_v45, %v535_v9 }
  0xea   : > { %v3456_v15 = vadd.f32 %v557_v14, %v462_v13  ;;  %v3458_v41 = vadd.f32 %v558_v40, %v463_v10 }
  0xec   : > { %v580_v42 = vpop.permute.xlu1 %579  ;;  %v584_v16 = vpop.permute.xlu0 %583 }
  0xed   : > { %v654_v34 = vmul.f32 %v3471_v29, %v580_v42  ;;  %v655_v54 = vmul.f32 %v3471_v29, %v584_v16 }
  0xef   : > { %v672_v47 = vadd.f32 %v654_v34, %v3374_v56  ;;  %v673_v62 = vadd.f32 %v655_v54, %v3372_v55 }
  0xf0   : > { %v588_v17 = vpop.permute.xlu1 %587  ;;  %v596_v18 = vpop.permute.xlu0 %595 }
  0xf1   : > { %v656_v38 = vmul.f32 %v3471_v29, %v588_v17  ;;  %v658_v10 = vmul.f32 %v3471_v29, %v596_v18 }
  0xf3   : > { %v674_v55 = vadd.f32 %v656_v38, %v3382_v1  ;;  %v676_v18 = vadd.f32 %v658_v10, %v3392_v11 }
  0xf4   : > { %v592_v19 = vpop.permute.xlu1 %591  ;;  %v604_v20 = vpop.permute.xlu0 %603 }
  0xf5   : > { %v657_v48 = vmul.f32 %v3471_v29, %v592_v19 }
  0xf7   : > { %v675_v36 = vadd.f32 %v657_v48, %v3384_v2 }
  0xf8   : > { %v600_v23 = vpop.permute.xlu1 %599  ;;  %v3460_v24 = vpop.permute.xlu0 %611 }
  0xf9   : > { %v659_v37 = vmul.f32 %v3471_v29, %v600_v23  ;;  %v662_v11 = vmul.f32 %v3471_v29, %v3460_v24 }
  0xfb   : > { %v677_v3 = vadd.f32 %v659_v37, %v3394_v12 }
  0xfc   : > { %v608_v25 = vpop.permute.xlu1 %607  ;;  %v3462_v26 = vpop.permute.xlu0 %619 }
  0xfd   : > { %v661_v63 = vmul.f32 %v3471_v29, %v608_v25 }
  0xff   : > { %v679_v13 = vadd.f32 %v661_v63, %v3404_v22  ;;  %v660_v22 = vmul.f32 %v3471_v29, %v604_v20 }
 0x100   : > { %v616_v46 = vpop.permute.xlu1 %615  ;;  %v3464_v27 = vpop.permute.xlu0 %627 }
 0x101   : > { %v663_v14 = vmul.f32 %v3471_v29, %v616_v46  ;;  %v678_v37 = vadd.f32 %v660_v22, %v3402_v21  ;;  %v680_v21 = vadd.f32 %v662_v11, %v3412_v31 }
 0x103   : > { %v681_v25 = vadd.f32 %v663_v14, %v3414_v32 }
 0x104   : > { %v624_v45 = vpop.permute.xlu1 %623  ;;  %v3466_v28 = vpop.permute.xlu0 %635 }
 0x108   : > { %v632_v30 = vpop.permute.xlu1 %631  ;;  %v3473_v33 = vpop.permute.xlu0 %643 }
 0x10c   : > { %v3481_v35 = vpop.permute.xlu1 %639 }
 0x10d   : > { %v693_v44 = vpop.permute.xlu0 %692 }
 0x10e   : > { %v767_v49 = vmul.f32 %v3479_v43, %v693_v44 }
 0x110   : > { %v3486_v52 = vadd.f32 %v767_v49, %v672_v47  ;;  %v3488_v53 = vpop.permute.xlu1 %647 }
 0x111   : > { %v705_v57 = vpop.permute.xlu0 %704  ;;  %v671_v22 = vmul.f32 %v3471_v29, %v3488_v53  ;;  %v668_v53 = vmul.f32 %v3471_v29, %v3466_v28 }
 0x112   : > { %v2478_v58 = vmul.f32 -1.442695, %v3486_v52  ;;  %v770_v59 = vmul.f32 %v3479_v43, %v705_v57  ;;  %v665_v57 = vmul.f32 %v3471_v29, %v624_v45 }
 0x113   : > { %v689_v11 = vadd.f32 %v671_v22, %v3458_v41 }
 0x114   : > { %2705 = vpow2.f32 %v2478_v58  ;;  %v3495_v56 = vadd.f32 %v770_v59, %v675_v36  ;;  %v667_v58 = vmul.f32 %v3471_v29, %v632_v30  ;;  %v664_v30 = vmul.f32 %v3471_v29, %v3462_v26 }
 0x115   : > { %v697_v39 = vpop.permute.xlu1 %696  ;;  %v713_v0 = vpop.permute.xlu0 %712 }
 0x116   : > { %v2481_v2 = vmul.f32 -1.442695, %v3495_v56  ;;  %v768_v4 = vmul.f32 %v3479_v43, %v697_v39  ;;  %v772_v5 = vmul.f32 %v3479_v43, %v713_v0  ;;  %v683_v39 = vadd.f32 %v665_v57, %v3426_v51 }
 0x118   : > { %2707 = vpow2.f32 %v2481_v2  ;;  %v3504_v8 = vadd.f32 %v768_v4, %v673_v62  ;;  %v3506_v9 = vadd.f32 %v772_v5, %v677_v3  ;;  %v666_v4 = vmul.f32 %v3471_v29, %v3464_v27 }
 0x119   : > { %v701_v12 = vpop.permute.xlu1 %700  ;;  %v721_v40 = vpop.permute.xlu0 %720  ;;  %v685_v5 = vadd.f32 %v667_v58, %v3438_v61 }
 0x11a   : > { %v2479_v42 = vmul.f32 -1.442695, %v3504_v8  ;;  %v2483_v16 = vmul.f32 -1.442695, %v3506_v9  ;;  %v769_v17 = vmul.f32 %v3479_v43, %v701_v12  ;;  %v774_v19 = vmul.f32 %v3479_v43, %v721_v40 }
 0x11b   : > { %v669_v40 = vmul.f32 %v3471_v29, %v3481_v35 }
 0x11c   : > { %2709 = vpow2.f32 %v2479_v42  ;;  %v3516_v23 = vadd.f32 %v769_v17, %v674_v55  ;;  %v3518_v1 = vadd.f32 %v774_v19, %v679_v13  ;;  %v682_v19 = vadd.f32 %v664_v30, %v3424_v50 }
 0x11d   : > { %2711 = vpow2.f32 %v2483_v16  ;;  %v709_v46 = vpop.permute.xlu1 %708  ;;  %v729_v34 = vpop.permute.xlu0 %728  ;;  %v670_v30 = vmul.f32 %v3471_v29, %v3473_v33 }
 0x11e   : > { %v2706_v44 = vpop.eup %2705  ;;  %v2480_v47 = vmul.f32 -1.442695, %v3516_v23  ;;  %v2485_v48 = vmul.f32 -1.442695, %v3518_v1  ;;  %v771_v49 = vmul.f32 %v3479_v43, %v709_v46  ;;  %v776_v54 = vmul.f32 %v3479_v43, %v729_v34 }
 0x11f   : > { %v857_v36 = vadd.f32 1.0, %v2706_v44 }
 0x120   : > { %2713 = vpow2.f32 %v2480_v47  ;;  %v3530_v32 = vadd.f32 %v771_v49, %v676_v18  ;;  %v3532_v20 = vadd.f32 %v776_v54, %v681_v25  ;;  %v684_v18 = vadd.f32 %v666_v4, %v3436_v60 }
 0x121   : > { %2715 = vrcp.f32 %v857_v36  ;;  %v717_v59 = vpop.permute.xlu1 %716  ;;  %v737_v62 = vpop.permute.xlu0 %736  ;;  %v687_v49 = vadd.f32 %v669_v40, %v3450_v7 }
 0x122   : > { %v2708_v38 = vpop.eup %2707  ;;  %2717 = vpow2.f32 %v2485_v48  ;;  %v2482_v45 = vmul.f32 -1.442695, %v3530_v32  ;;  %v2487_v63 = vmul.f32 -1.442695, %v3532_v20  ;;  %v773_v24 = vmul.f32 %v3479_v43, %v717_v59 }
 0x123   : > { %v860_v0 = vadd.f32 1.0, %v2708_v38  ;;  %v778_v3 = vmul.f32 %v3479_v43, %v737_v62 }
 0x124   : > { %2719 = vpow2.f32 %v2482_v45  ;;  %v3544_v2 = vadd.f32 %v773_v24, %v678_v37 }
 0x125   : > { %2721 = vrcp.f32 %v860_v0  ;;  %v3549_v55 = vadd.f32 %v778_v3, %v683_v39  ;;  %v725_v51 = vpop.permute.xlu1 %724  ;;  %v745_v10 = vpop.permute.xlu0 %744 }
 0x126   : > { %v2710_v13 = vpop.eup %2709  ;;  %2723 = vpow2.f32 %v2487_v63  ;;  %v2484_v31 = vmul.f32 -1.442695, %v3544_v2  ;;  %v775_v14 = vmul.f32 %v3479_v43, %v725_v51  ;;  %v780_v26 = vmul.f32 %v3479_v43, %v745_v10 }
 0x127   : > { %v2712_v12 = vpop.eup %2711  ;;  %v858_v27 = vadd.f32 1.0, %v2710_v13  ;;  %v2489_v61 = vmul.f32 -1.442695, %v3549_v55 }
 0x128   : > { %v862_v42 = vadd.f32 1.0, %v2712_v12  ;;  %2725 = vpow2.f32 %v2484_v31  ;;  %v3557_v16 = vadd.f32 %v775_v14, %v680_v21  ;;  %v3559_v17 = vadd.f32 %v780_v26, %v685_v5 }
 0x129   : > { %2727 = vrcp.f32 %v858_v27  ;;  %v733_v25 = vpop.permute.xlu1 %732  ;;  %v753_v46 = vpop.permute.xlu0 %752  ;;  %v686_v21 = vadd.f32 %v668_v53, %v3448_v6  ;;  %v688_v12 = vadd.f32 %v670_v30, %v3456_v15 }
 0x12a   : > { %v2714_v35 = vpop.eup %2713  ;;  %2729 = vrcp.f32 %v862_v42  ;;  %v2486_v34 = vmul.f32 -1.442695, %v3557_v16  ;;  %v2491_v44 = vmul.f32 -1.442695, %v3559_v17  ;;  %v777_v47 = vmul.f32 %v3479_v43, %v733_v25 }
 0x12b   : > { %v2716_v48 = vpop.eup %2715  ;;  %v859_v50 = vadd.f32 1.0, %v2714_v35  ;;  %2731 = vpow2.f32 %v2489_v61  ;;  %v782_v60 = vmul.f32 %v3479_v43, %v753_v46 }
 0x12c   : > { %v2718_v54 = vpop.eup %2717  ;;  %v911_v57 = vmul.f32 %v2716_v48, %v3486_v52  ;;  %2733 = vpow2.f32 %v2486_v34  ;;  %v3573_v36 = vadd.f32 %v777_v47, %v682_v19 }
 0x12d   : > { %2735 = vrcp.f32 %v859_v50  ;;  %v864_v37 = vadd.f32 1.0, %v2718_v54  ;;  %v3576_v58 = vadd.f32 %v782_v60, %v687_v49  ;;  %v741_v7 = vpop.permute.xlu1 %740  ;;  %v761_v59 = vpop.permute.xlu0 %760 }
 0x12e   : > { %v2720_v62 = vpop.eup %2719  ;;  %930 = vst.msk [vmem:[#allocation2 + $0x19] sm:$0xff] %vm303_vm1, %v911_v57  ;;  %2737 = vpow2.f32 %v2491_v44  ;;  %v2488_v38 = vmul.f32 -1.442695, %v3573_v36  ;;  %v779_v28 = vmul.f32 %v3479_v43, %v741_v7  ;;  %v784_v52 = vmul.f32 %v3479_v43, %v761_v59 }
 0x12f   : > { %v2722_v45 = vpop.eup %2721  ;;  %2739 = vrcp.f32 %v864_v37  ;;  %v861_v63 = vadd.f32 1.0, %v2720_v62  ;;  %v2493_v41 = vmul.f32 -1.442695, %v3576_v58 }
 0x130   : > { %v2724_v24 = vpop.eup %2723  ;;  %v914_v39 = vmul.f32 %v2722_v45, %v3495_v56  ;;  %2741 = vpow2.f32 %v2488_v38  ;;  %v3584_v0 = vadd.f32 %v779_v28, %v684_v18  ;;  %v3586_v3 = vadd.f32 %v784_v52, %v689_v11 }
 0x131   : > { %2743 = vrcp.f32 %v861_v63  ;;  %v866_v4 = vadd.f32 1.0, %v2724_v24  ;;  %v749_v5 = vpop.permute.xlu1 %748 }
 0x132   : > { %v2726_v51 = vpop.eup %2725  ;;  %933 = vst.msk [vmem:[#allocation2 + $0x39] sm:$0xff] %vm303_vm1, %v914_v39  ;;  %2745 = vpow2.f32 %v2493_v41  ;;  %v2490_v10 = vmul.f32 -1.442695, %v3584_v0  ;;  %v2495_v56 = vmul.f32 -1.442695, %v3586_v3  ;;  %v781_v13 = vmul.f32 %v3479_v43, %v749_v5 }
 0x133   : > { %v2728_v31 = vpop.eup %2727  ;;  %2747 = vrcp.f32 %v866_v4  ;;  %v863_v14 = vadd.f32 1.0, %v2726_v51 }
 0x134   : > { %v2730_v6 = vpop.eup %2729  ;;  %v912_v26 = vmul.f32 %v2728_v31, %v3504_v8  ;;  %2749 = vpow2.f32 %v2490_v10  ;;  %v3596_v29 = vadd.f32 %v781_v13, %v686_v21 }
 0x135   : > { %v2732_v33 = vpop.eup %2731  ;;  %v916_v40 = vmul.f32 %v2730_v6, %v3506_v9  ;;  %2751 = vrcp.f32 %v863_v14  ;;  %v757_v27 = vpop.permute.xlu1 %756 }
 0x136   : > { %v2734_v61 = vpop.eup %2733  ;;  %931 = vst.msk [vmem:[#allocation2 + $0x21] sm:$0xff] %vm303_vm1, %v912_v26  ;;  %v868_v42 = vadd.f32 1.0, %v2732_v33  ;;  %2753 = vpow2.f32 %v2495_v56  ;;  %v2492_v19 = vmul.f32 -1.442695, %v3596_v29  ;;  %v783_v18 = vmul.f32 %v3479_v43, %v757_v27 }
 0x137   : > { %v2736_v8 = vpop.eup %2735  ;;  %935 = vst.msk [vmem:[#allocation2 + $0x51] sm:$0xff] %vm303_vm1, %v916_v40  ;;  %v865_v22 = vadd.f32 1.0, %v2734_v61 }
 0x138   : > { %v2738_v25 = vpop.eup %2737  ;;  %v913_v15 = vmul.f32 %v2736_v8, %v3516_v23  ;;  %2755 = vrcp.f32 %v868_v42  ;;  %v3605_v9 = vadd.f32 %v783_v18, %v688_v12 }
 0x139   : > { %v2740_v46 = vpop.eup %2739  ;;  %2757 = vrcp.f32 %v865_v22  ;;  %v870_v35 = vadd.f32 1.0, %v2738_v25 }
 0x13a   : > { %v2742_v34 = vpop.eup %2741  ;;  %932 = vst.msk [vmem:[#allocation2 + $0x31] sm:$0xff] %vm303_vm1, %v913_v15  ;;  %v918_v44 = vmul.f32 %v2740_v46, %v3518_v1  ;;  %2759 = vpow2.f32 %v2492_v19  ;;  %v2494_v43 = vmul.f32 -1.442695, %v3605_v9 }
 0x13b   : > { %v2744_v47 = vpop.eup %2743  ;;  %2761 = vrcp.f32 %v870_v35  ;;  %v867_v48 = vadd.f32 1.0, %v2742_v34 }
 0x13c   : > { %v2746_v49 = vpop.eup %2745  ;;  %937 = vst.msk [vmem:[#allocation2 + $0x69] sm:$0xff] %vm303_vm1, %v918_v44  ;;  %v915_v23 = vmul.f32 %v2744_v47, %v3530_v32  ;;  %2763 = vpow2.f32 %v2494_v43 }
 0x13d   : > { %v2748_v50 = vpop.eup %2747  ;;  %2765 = vrcp.f32 %v867_v48  ;;  %v872_v60 = vadd.f32 1.0, %v2746_v49 }
 0x13e   : > { %v2750_v54 = vpop.eup %2749  ;;  %934 = vst.msk [vmem:[#allocation2 + $0x49] sm:$0xff] %vm303_vm1, %v915_v23  ;;  %v920_v1 = vmul.f32 %v2748_v50, %v3532_v20 }
 0x13f   : > { %v2752_v53 = vpop.eup %2751  ;;  %2767 = vrcp.f32 %v872_v60  ;;  %v869_v57 = vadd.f32 1.0, %v2750_v54 }
 0x140   : > { %v2754_v11 = vpop.eup %2753  ;;  %939 = vst.msk [vmem:[#allocation2 + $0x81] sm:$0xff] %vm303_vm1, %v920_v1  ;;  %v917_v37 = vmul.f32 %v2752_v53, %v3544_v2 }
 0x141   : > { %2769 = vrcp.f32 %v869_v57  ;;  %v874_v7 = vadd.f32 1.0, %v2754_v11 }
 0x142   : > { %v2756_v32 = vpop.eup %2755  ;;  %936 = vst.msk [vmem:[#allocation2 + $0x61] sm:$0xff] %vm303_vm1, %v917_v37 }
 0x143   : > { %v2758_v59 = vpop.eup %2757  ;;  %v922_v62 = vmul.f32 %v2756_v32, %v3549_v55  ;;  %2771 = vrcp.f32 %v874_v7 }
 0x144   : > { %v2760_v38 = vpop.eup %2759  ;;  %v919_v20 = vmul.f32 %v2758_v59, %v3557_v16 }
 0x145   : > { %v2762_v28 = vpop.eup %2761  ;;  %941 = vst.msk [vmem:[#allocation2 + $0x99] sm:$0xff] %vm303_vm1, %v922_v62  ;;  %v871_v52 = vadd.f32 1.0, %v2760_v38 }
 0x146   : > { %v2764_v45 = vpop.eup %2763  ;;  %938 = vst.msk [vmem:[#allocation2 + $0x79] sm:$0xff] %vm303_vm1, %v919_v20  ;;  %v924_v2 = vmul.f32 %v2762_v28, %v3559_v17 }
 0x147   : > { %v2766_v63 = vpop.eup %2765  ;;  %2773 = vrcp.f32 %v871_v52  ;;  %v873_v41 = vadd.f32 1.0, %v2764_v45 }
 0x148   : > { %943 = vst.msk [vmem:[#allocation2 + $0xb1] sm:$0xff] %vm303_vm1, %v924_v2  ;;  %v921_v55 = vmul.f32 %v2766_v63, %v3573_v36 }
 0x149   : > { %v2768_v24 = vpop.eup %2767  ;;  %2775 = vrcp.f32 %v873_v41 }
 0x14a   : > { %940 = vst.msk [vmem:[#allocation2 + $0x91] sm:$0xff] %vm303_vm1, %v921_v55  ;;  %v926_v16 = vmul.f32 %v2768_v24, %v3576_v58 }
 0x14b   : > { %v2770_v39 = vpop.eup %2769 }
 0x14c   : > { %945 = vst.msk [vmem:[#allocation2 + $0xc9] sm:$0xff] %vm303_vm1, %v926_v16  ;;  %v923_v21 = vmul.f32 %v2770_v39, %v3584_v0 }
 0x14d   : > { %v2772_v30 = vpop.eup %2771 }
 0x14e   : > { %942 = vst.msk [vmem:[#allocation2 + $0xa9] sm:$0xff] %vm303_vm1, %v923_v21  ;;  %v928_v17 = vmul.f32 %v2772_v30, %v3586_v3 }
 0x150   : > { %947 = vst.msk [vmem:[#allocation2 + $0xe1] sm:$0xff] %vm303_vm1, %v928_v17 }
 0x151   : > { %v2774_v4 = vpop.eup %2773 }
 0x152   : > { %v925_v36 = vmul.f32 %v2774_v4, %v3596_v29 }
 0x153   : > { %v2776_v5 = vpop.eup %2775 }
 0x154   : > { %944 = vst.msk [vmem:[#allocation2 + $0xc1] sm:$0xff] %vm303_vm1, %v925_v36  ;;  %v927_v58 = vmul.f32 %v2776_v5, %v3605_v9 }
 0x156   : > { %946 = vst.msk [vmem:[#allocation2 + $0xd9] sm:$0xff] %vm303_vm1, %v927_v58 }
 0x157 PF: > { %p2496_p0 = scmp.ne.s32.totalorder %s3031_s24, 1 }
 0x158   : > { %v3637_v0 = vld [vmem:[%s3202_s9 + $0x80] sm:$0xff] (!%p2496_p0)  ;;  %v3640_v3 = vld [vmem:[%s3202_s9 + $0x70] sm:$0xff] (!%p2496_p0)  ;;  %v3055_v51 = vmov (!%p2496_p0), 0   ;;  %v3645_v10 = vld [vmem:[%s3202_s9 + $0x88] sm:$0xff] (!%p2496_p0)  ;;  %v3056_v8 = vmov (!%p2496_p0), 1   ;;  %v3057_v22 = vmov (!%p2496_p0), 2  }
 0x159   : > { %951 = sbr.rel (%p2496_p0) target bundleno = 654 (0x28e), region = 48  ;;  %2778 = vset.pattern.permute.xlu1 (!%p2496_p0), %v3055_v51  ;;  %2777 = vset.pattern.permute.xlu0 (!%p2496_p0), %v3055_v51  ;;  %v3648_v56 = vld [vmem:[%s3202_s9 + $0x78] sm:$0xff] (!%p2496_p0)  ;;  %v3656_v31 = vld [vmem:[%s3202_s9 + $0x90] sm:$0xff] (!%p2496_p0)  ;;  %v3661_v14 = vld [vmem:[%s3202_s9 + $0xa8] sm:$0xff] (!%p2496_p0)  ;;  %v3058_v25 = vmov (!%p2496_p0), 3   ;;  %vm953_vm3 = vcmask (!%p2496_p0), 130048  }
 0x15a   : > { %997 = vperm.xlu1 (!%p2496_p0), %2778, %v3637_v0   ;;  %987 = vperm.xlu0 (!%p2496_p0), %2777, %v3640_v3   ;;  %v3653_v13 = vld [vmem:[%s3202_s9 + $0x98] sm:$0xff] (!%p2496_p0)  ;;  %v3664_v6 = vld [vmem:[%s3202_s9 + $0xa0] sm:$0xff] (!%p2496_p0)  ;;  %v3672_v29 = vld [vmem:[%s3202_s9 + $0xb0] sm:$0xff] (!%p2496_p0)  ;;  %vm956_vm4 = vcmask (!%p2496_p0), 123904   ;;  %v3059_v15 = vmov (!%p2496_p0), 0.0   ;;  %s4672_s1 = sld [smem:[#allocation10_spill]] (!%p2496_p0) }
 0x15b   : > { %v3669_v26 = vld [vmem:[%s3202_s9 + $0xb8] sm:$0xff] (!%p2496_p0)  ;;  %v3677_v33 = vld [vmem:[%s3202_s9 + $0xc8] sm:$0xff] (!%p2496_p0)  ;;  %v3680_v12 = vld [vmem:[%s3202_s9 + $0xc0] sm:$0xff] (!%p2496_p0)  ;;  %954 = vst.msk [vmem:[#allocation2 + $0xd8] sm:$0xff] (!%p2496_p0), %vm953_vm3, %v3059_v15  ;;  %s4673_s2 = sld [smem:[#allocation11_spill]] (!%p2496_p0) }
 0x15c   : > { %v3685_v40 = vld [vmem:[%s3202_s9 + $0xd8] sm:$0xff] (!%p2496_p0)  ;;  %v3688_v27 = vld [vmem:[%s3202_s9 + $0xd0] sm:$0xff] (!%p2496_p0)  ;;  %v3693_v61 = vld [vmem:[%s3202_s9 + $0xe8] sm:$0xff] (!%p2496_p0)  ;;  %955 = vst.msk [vmem:[#allocation2 + $0xe0] sm:$0xff] (!%p2496_p0), %vm953_vm3, %v3059_v15 }
 0x15d   : > { %v3696_v42 = vld [vmem:[%s3202_s9 + $0xe0] sm:$0xff] (!%p2496_p0)  ;;  %v3701_v19 = vld [vmem:[%s3202_s9 + $0xf8] sm:$0xff] (!%p2496_p0)  ;;  %v3704_v18 = vld [vmem:[%s3202_s9 + $0xf0] sm:$0xff] (!%p2496_p0)  ;;  %957 = vst.msk [vmem:[#allocation2 + $0xe8] sm:$0x3] (!%p2496_p0), %vm956_vm4, %v3059_v15 }
 0x15e   : > { %1002 = vperm.xlu1 (!%p2496_p0), %2778, %v3645_v10   ;;  %992 = vperm.xlu0 (!%p2496_p0), %2777, %v3648_v56  }
 0x160   : > { %v3779_v7 = vld [vmem:[%s4672_s1] ss:$0 sm:$0xff]  ;;  %v3786_v62 = vld [vmem:[%s4672_s1 + $0x1] ss:$0 sm:$0xff] }
 0x161   : > { %v3791_v38 = vld [vmem:[%s4673_s2] ss:$0 sm:$0xff] }
 0x162   : > { %1012 = vperm.xlu1 %2778, %v3653_v13   ;;  %1007 = vperm.xlu0 %2777, %v3656_v31  }
 0x166   : > { %1022 = vperm.xlu1 %2778, %v3661_v14   ;;  %1017 = vperm.xlu0 %2777, %v3664_v6  }
 0x16a   : > { %1032 = vperm.xlu1 %2778, %v3669_v26   ;;  %1027 = vperm.xlu0 %2777, %v3672_v29  }
 0x16e   : > { %1042 = vperm.xlu1 %2778, %v3677_v33   ;;  %1037 = vperm.xlu0 %2777, %v3680_v12  }
 0x172   : > { %1052 = vperm.xlu1 %2778, %v3685_v40   ;;  %1047 = vperm.xlu0 %2777, %v3688_v27  }
 0x176   : > { %1062 = vperm.xlu1 %2778, %v3693_v61   ;;  %1057 = vperm.xlu0 %2777, %v3696_v42  }
 0x17a   : > { %1072 = vperm.xlu1 %2778, %v3701_v19   ;;  %1067 = vperm.xlu0 %2777, %v3704_v18  }
 0x17e   : > { %2780 = vset.pattern.permute.xlu1 %v3056_v8  ;;  %2779 = vset.pattern.permute.xlu0 %v3056_v8 }
 0x17f   : > { %1121 = vperm.xlu1 %2780, %v3648_v56   ;;  %1117 = vperm.xlu0 %2779, %v3640_v3  }
 0x183   : > { %1125 = vperm.xlu1 %2780, %v3637_v0   ;;  %1129 = vperm.xlu0 %2779, %v3645_v10  }
 0x187   : > { %1133 = vperm.xlu1 %2780, %v3656_v31   ;;  %1137 = vperm.xlu0 %2779, %v3653_v13  }
 0x18b   : > { %1141 = vperm.xlu1 %2780, %v3664_v6   ;;  %1145 = vperm.xlu0 %2779, %v3661_v14  }
 0x18f   : > { %1149 = vperm.xlu1 %2780, %v3672_v29   ;;  %1153 = vperm.xlu0 %2779, %v3669_v26  }
 0x193   : > { %1157 = vperm.xlu1 %2780, %v3680_v12   ;;  %1161 = vperm.xlu0 %2779, %v3677_v33  }
 0x197   : > { %1165 = vperm.xlu1 %2780, %v3688_v27   ;;  %1169 = vperm.xlu0 %2779, %v3685_v40  }
 0x19b   : > { %1173 = vperm.xlu1 %2780, %v3696_v42   ;;  %1177 = vperm.xlu0 %2779, %v3693_v61  }
 0x19f   : > { %1181 = vperm.xlu1 %2780, %v3704_v18   ;;  %1185 = vperm.xlu0 %2779, %v3701_v19  }
 0x1a3   : > { %2781 = vset.pattern.permute.xlu1 %v3057_v22  ;;  %2782 = vset.pattern.permute.xlu0 %v3057_v22 }
 0x1a4   : > { %1230 = vperm.xlu1 %2781, %v3640_v3   ;;  %1234 = vperm.xlu0 %2782, %v3648_v56  }
 0x1a8   : > { %1238 = vperm.xlu1 %2781, %v3637_v0   ;;  %1246 = vperm.xlu0 %2782, %v3656_v31  }
 0x1ac   : > { %1242 = vperm.xlu1 %2781, %v3645_v10   ;;  %1254 = vperm.xlu0 %2782, %v3664_v6  }
 0x1b0   : > { %1250 = vperm.xlu1 %2781, %v3653_v13   ;;  %1262 = vperm.xlu0 %2782, %v3672_v29  }
 0x1b4   : > { %1258 = vperm.xlu1 %2781, %v3661_v14   ;;  %1270 = vperm.xlu0 %2782, %v3680_v12  }
 0x1b8   : > { %1266 = vperm.xlu1 %2781, %v3669_v26   ;;  %1278 = vperm.xlu0 %2782, %v3688_v27  }
 0x1bc   : > { %1274 = vperm.xlu1 %2781, %v3677_v33   ;;  %1286 = vperm.xlu0 %2782, %v3696_v42  }
 0x1c0   : > { %1282 = vperm.xlu1 %2781, %v3685_v40   ;;  %1294 = vperm.xlu0 %2782, %v3704_v18  }
 0x1c4   : > { %1290 = vperm.xlu1 %2781, %v3693_v61   ;;  %2783 = vset.pattern.permute.xlu0 %v3058_v25 }
 0x1c5   : > { %1343 = vperm.xlu0 %2783, %v3640_v3  }
 0x1c8   : > { %1298 = vperm.xlu1 %2781, %v3701_v19  }
 0x1c9   : > { %1355 = vperm.xlu0 %2783, %v3645_v10  }
 0x1cc   : > { %2784 = vset.pattern.permute.xlu1 %v3058_v25 }
 0x1cd   : > { %1347 = vperm.xlu1 %2784, %v3648_v56   ;;  %1363 = vperm.xlu0 %2783, %v3653_v13  }
 0x1d1   : > { %1351 = vperm.xlu1 %2784, %v3637_v0   ;;  %1371 = vperm.xlu0 %2783, %v3661_v14  }
 0x1d5   : > { %1359 = vperm.xlu1 %2784, %v3656_v31   ;;  %1379 = vperm.xlu0 %2783, %v3669_v26  }
 0x1d9   : > { %v998_v9 = vpop.permute.xlu1 %997  ;;  %1367 = vperm.xlu1 %2784, %v3664_v6   ;;  %1387 = vperm.xlu0 %2783, %v3677_v33   ;;  %v988_v46 = vpop.permute.xlu0 %987 }
 0x1da   : > { %v1079_v32 = vmul.f32 %v3779_v7, %v988_v46  ;;  %v1081_v20 = vmul.f32 %v3779_v7, %v998_v9 }
 0x1dc   : > { %v1097_v2 = vadd.f32 %v3791_v38, %v1079_v32  ;;  %v1099_v39 = vadd.f32 %v3791_v38, %v1081_v20 }
 0x1dd   : > { %v1003_v35 = vpop.permute.xlu1 %1002  ;;  %1375 = vperm.xlu1 %2784, %v3672_v29   ;;  %1395 = vperm.xlu0 %2783, %v3685_v40   ;;  %v993_v34 = vpop.permute.xlu0 %992 }
 0x1de   : > { %v1080_v59 = vmul.f32 %v3779_v7, %v993_v34  ;;  %v1082_v28 = vmul.f32 %v3779_v7, %v1003_v35 }
 0x1e0   : > { %v1098_v63 = vadd.f32 %v3791_v38, %v1080_v59  ;;  %v1100_v21 = vadd.f32 %v3791_v38, %v1082_v28 }
 0x1e1   : > { %v1013_v44 = vpop.permute.xlu1 %1012  ;;  %1383 = vperm.xlu1 %2784, %v3680_v12   ;;  %1403 = vperm.xlu0 %2783, %v3693_v61   ;;  %v1008_v43 = vpop.permute.xlu0 %1007 }
 0x1e2   : > { %v1084_v4 = vmul.f32 %v3779_v7, %v1013_v44  ;;  %v1083_v36 = vmul.f32 %v3779_v7, %v1008_v43 }
 0x1e4   : > { %v1102_v31 = vadd.f32 %v3791_v38, %v1084_v4  ;;  %v1101_v14 = vadd.f32 %v3791_v38, %v1083_v36 }
 0x1e5   : > { %v1023_v47 = vpop.permute.xlu1 %1022  ;;  %1391 = vperm.xlu1 %2784, %v3688_v27   ;;  %1411 = vperm.xlu0 %2783, %v3701_v19   ;;  %v1018_v48 = vpop.permute.xlu0 %1017 }
 0x1e6   : > { %v1086_v51 = vmul.f32 %v3779_v7, %v1023_v47  ;;  %v1085_v10 = vmul.f32 %v3779_v7, %v1018_v48 }
 0x1e8   : > { %v1104_v12 = vadd.f32 %v3791_v38, %v1086_v51  ;;  %v1103_v40 = vadd.f32 %v3791_v38, %v1085_v10 }
 0x1e9   : > { %v1033_v49 = vpop.permute.xlu1 %1032  ;;  %1399 = vperm.xlu1 %2784, %v3696_v42   ;;  %v1028_v23 = vpop.permute.xlu0 %1027 }
 0x1ea   : > { %v1088_v42 = vmul.f32 %v3779_v7, %v1033_v49  ;;  %v1087_v19 = vmul.f32 %v3779_v7, %v1028_v23 }
 0x1ec   : > { %v1106_v34 = vadd.f32 %v3791_v38, %v1088_v42  ;;  %v1105_v44 = vadd.f32 %v3791_v38, %v1087_v19 }
 0x1ed   : > { %v1043_v50 = vpop.permute.xlu1 %1042  ;;  %1407 = vperm.xlu1 %2784, %v3704_v18   ;;  %v1038_v60 = vpop.permute.xlu0 %1037 }
 0x1ee   : > { %v1090_v15 = vmul.f32 %v3779_v7, %v1043_v50  ;;  %v1089_v9 = vmul.f32 %v3779_v7, %v1038_v60 }
 0x1f0   : > { %v1108_v23 = vadd.f32 %v3791_v38, %v1090_v15  ;;  %v1107_v50 = vadd.f32 %v3791_v38, %v1089_v9 }
 0x1f1   : > { %v3764_v54 = vpop.permute.xlu1 %1052  ;;  %v3766_v1 = vpop.permute.xlu0 %1047 }
 0x1f2   : > { %v1092_v59 = vmul.f32 %v3779_v7, %v3764_v54  ;;  %v1091_v20 = vmul.f32 %v3779_v7, %v3766_v1 }
 0x1f4   : > { %v1110_v54 = vadd.f32 %v3791_v38, %v1092_v59  ;;  %v1109_v1 = vadd.f32 %v3791_v38, %v1091_v20 }
 0x1f5   : > { %v3768_v53 = vpop.permute.xlu1 %1062  ;;  %v3770_v57 = vpop.permute.xlu0 %1057 }
 0x1f9   : > { %v3772_v11 = vpop.permute.xlu1 %1072  ;;  %v3774_v37 = vpop.permute.xlu0 %1067 }
 0x1fa   : > { %v1095_v51 = vmul.f32 %v3779_v7, %v3774_v37 }
 0x1fe   : > { %v1122_v52 = vpop.permute.xlu1 %1121  ;;  %v1118_v45 = vpop.permute.xlu0 %1117 }
 0x1ff   : > { %v1193_v41 = vmul.f32 %v3786_v62, %v1122_v52  ;;  %v1192_v55 = vmul.f32 %v3786_v62, %v1118_v45 }
 0x201   : > { %v3799_v24 = vadd.f32 %v1193_v41, %v1098_v63  ;;  %v3801_v16 = vadd.f32 %v1192_v55, %v1097_v2  ;;  %v1094_v63 = vmul.f32 %v3779_v7, %v3768_v53  ;;  %v1093_v41 = vmul.f32 %v3779_v7, %v3770_v57 }
 0x202   : > { %v1126_v30 = vpop.permute.xlu1 %1125  ;;  %v1130_v17 = vpop.permute.xlu0 %1129 }
 0x203   : > { %v1194_v5 = vmul.f32 %v3786_v62, %v1126_v30  ;;  %v1195_v58 = vmul.f32 %v3786_v62, %v1130_v17  ;;  %v1112_v36 = vadd.f32 %v3791_v38, %v1094_v63  ;;  %v1111_v53 = vadd.f32 %v3791_v38, %v1093_v41 }
 0x205   : > { %v3809_v0 = vadd.f32 %v1194_v5, %v1099_v39  ;;  %v3811_v3 = vadd.f32 %v1195_v58, %v1100_v21  ;;  %v1096_v58 = vmul.f32 %v3779_v7, %v3772_v11 }
 0x206   : > { %v1134_v56 = vpop.permute.xlu1 %1133  ;;  %v1138_v13 = vpop.permute.xlu0 %1137 }
 0x207   : > { %v1196_v6 = vmul.f32 %v3786_v62, %v1134_v56  ;;  %v1197_v26 = vmul.f32 %v3786_v62, %v1138_v13 }
 0x209   : > { %v3819_v29 = vadd.f32 %v1196_v6, %v1101_v14  ;;  %v3821_v33 = vadd.f32 %v1197_v26, %v1102_v31  ;;  %v1114_v26 = vadd.f32 %v3791_v38, %v1096_v58 }
 0x20a   : > { %v1142_v27 = vpop.permute.xlu1 %1141  ;;  %v1146_v61 = vpop.permute.xlu0 %1145 }
 0x20b   : > { %v1198_v18 = vmul.f32 %v3786_v62, %v1142_v27  ;;  %v1199_v8 = vmul.f32 %v3786_v62, %v1146_v61 }
 0x20d   : > { %v3829_v22 = vadd.f32 %v1198_v18, %v1103_v40  ;;  %v3831_v25 = vadd.f32 %v1199_v8, %v1104_v12  ;;  %v1113_v12 = vadd.f32 %v3791_v38, %v1095_v51 }
 0x20e   : > { %v1150_v46 = vpop.permute.xlu1 %1149  ;;  %v1154_v35 = vpop.permute.xlu0 %1153 }
 0x20f   : > { %v1200_v43 = vmul.f32 %v3786_v62, %v1150_v46  ;;  %v1201_v47 = vmul.f32 %v3786_v62, %v1154_v35 }
 0x211   : > { %v3839_v48 = vadd.f32 %v1200_v43, %v1105_v44  ;;  %v3841_v49 = vadd.f32 %v1201_v47, %v1106_v34  ;;  %v3898_v43 = vld [vmem:[%s4672_s1 + $0x2] ss:$0 sm:$0xff] }
 0x212   : > { %v1158_v32 = vpop.permute.xlu1 %1157  ;;  %v1162_v60 = vpop.permute.xlu0 %1161 }
 0x213   : > { %v1202_v28 = vmul.f32 %v3786_v62, %v1158_v32  ;;  %v1203_v52 = vmul.f32 %v3786_v62, %v1162_v60  ;;  %v3906_v32 = vld [vmem:[%s4672_s1 + $0x3] ss:$0 sm:$0xff] }
 0x215   : > { %v3851_v45 = vadd.f32 %v1202_v28, %v1107_v50  ;;  %v3853_v2 = vadd.f32 %v1203_v52, %v1108_v23 }
 0x216   : > { %v1166_v55 = vpop.permute.xlu1 %1165  ;;  %v1170_v39 = vpop.permute.xlu0 %1169 }
 0x217   : > { %v1204_v21 = vmul.f32 %v3786_v62, %v1166_v55  ;;  %v1205_v30 = vmul.f32 %v3786_v62, %v1170_v39 }
 0x219   : > { %v3863_v17 = vadd.f32 %v1204_v21, %v1109_v1  ;;  %v3865_v4 = vadd.f32 %v1205_v30, %v1110_v54 }
 0x21a   : > { %v1174_v5 = vpop.permute.xlu1 %1173  ;;  %v1178_v57 = vpop.permute.xlu0 %1177 }
 0x21b   : > { %v1206_v10 = vmul.f32 %v3786_v62, %v1174_v5  ;;  %v1207_v56 = vmul.f32 %v3786_v62, %v1178_v57 }
 0x21d   : > { %v3875_v13 = vadd.f32 %v1206_v10, %v1111_v53  ;;  %v3877_v31 = vadd.f32 %v1207_v56, %v1112_v36 }
 0x21e   : > { %v1182_v14 = vpop.permute.xlu1 %1181  ;;  %v1186_v6 = vpop.permute.xlu0 %1185 }
 0x21f   : > { %v1208_v40 = vmul.f32 %v3786_v62, %v1182_v14  ;;  %v1209_v11 = vmul.f32 %v3786_v62, %v1186_v6 }
 0x221   : > { %v3883_v27 = vadd.f32 %v1208_v40, %v1113_v12  ;;  %v3885_v37 = vadd.f32 %v1209_v11, %v1114_v26 }
 0x223   : > { %v1231_v7 = vpop.permute.xlu1 %1230  ;;  %v1235_v61 = vpop.permute.xlu0 %1234 }
 0x224   : > { %v1305_v50 = vmul.f32 %v3898_v43, %v1231_v7  ;;  %v1306_v55 = vmul.f32 %v3898_v43, %v1235_v61 }
 0x226   : > { %v1323_v20 = vadd.f32 %v1305_v50, %v3801_v16  ;;  %v1324_v36 = vadd.f32 %v1306_v55, %v3799_v24 }
 0x227   : > { %v1239_v42 = vpop.permute.xlu1 %1238  ;;  %v1247_v19 = vpop.permute.xlu0 %1246 }
 0x228   : > { %v1307_v53 = vmul.f32 %v3898_v43, %v1239_v42  ;;  %v1309_v26 = vmul.f32 %v3898_v43, %v1247_v19 }
 0x22a   : > { %v1325_v24 = vadd.f32 %v1307_v53, %v3809_v0  ;;  %v1327_v19 = vadd.f32 %v1309_v26, %v3819_v29 }
 0x22b   : > { %v1243_v18 = vpop.permute.xlu1 %1242  ;;  %v1255_v8 = vpop.permute.xlu0 %1254 }
 0x22c   : > { %v1308_v28 = vmul.f32 %v3898_v43, %v1243_v18 }
 0x22e   : > { %v1326_v54 = vadd.f32 %v1308_v28, %v3811_v3 }
 0x22f   : > { %v1251_v15 = vpop.permute.xlu1 %1250  ;;  %v3887_v9 = vpop.permute.xlu0 %1262 }
 0x230   : > { %v1310_v1 = vmul.f32 %v3898_v43, %v1251_v15  ;;  %v1313_v29 = vmul.f32 %v3898_v43, %v3887_v9 }
 0x232   : > { %v1328_v51 = vadd.f32 %v1310_v1, %v3821_v33 }
 0x233   : > { %v1259_v46 = vpop.permute.xlu1 %1258  ;;  %v3889_v35 = vpop.permute.xlu0 %1270 }
 0x234   : > { %v1312_v5 = vmul.f32 %v3898_v43, %v1259_v46 }
 0x236   : > { %v1330_v12 = vadd.f32 %v1312_v5, %v3831_v25  ;;  %v1311_v25 = vmul.f32 %v3898_v43, %v1255_v8 }
 0x237   : > { %v1267_v38 = vpop.permute.xlu1 %1266  ;;  %v3891_v34 = vpop.permute.xlu0 %1278 }
 0x238   : > { %v1314_v40 = vmul.f32 %v3898_v43, %v1267_v38  ;;  %v1329_v1 = vadd.f32 %v1311_v25, %v3829_v22  ;;  %v1331_v22 = vadd.f32 %v1313_v29, %v3839_v48 }
 0x23a   : > { %v1332_v46 = vadd.f32 %v1314_v40, %v3841_v49 }
 0x23b   : > { %v1275_v62 = vpop.permute.xlu1 %1274  ;;  %v3893_v44 = vpop.permute.xlu0 %1286 }
 0x23f   : > { %v1283_v47 = vpop.permute.xlu1 %1282  ;;  %v3900_v23 = vpop.permute.xlu0 %1294 }
 0x243   : > { %v3908_v60 = vpop.permute.xlu1 %1290 }
 0x244   : > { %v1344_v59 = vpop.permute.xlu0 %1343 }
 0x245   : > { %v1418_v52 = vmul.f32 %v3906_v32, %v1344_v59 }
 0x247   : > { %v3913_v63 = vadd.f32 %v1418_v52, %v1323_v20  ;;  %v3915_v41 = vpop.permute.xlu1 %1298 }
 0x248   : > { %v1356_v39 = vpop.permute.xlu0 %1355  ;;  %v1322_v25 = vmul.f32 %v3898_v43, %v3915_v41  ;;  %v1319_v41 = vmul.f32 %v3898_v43, %v3893_v44 }
 0x249   : > { %v2520_v21 = vmul.f32 -1.442695, %v3913_v63  ;;  %v1421_v30 = vmul.f32 %v3906_v32, %v1356_v39  ;;  %v1316_v39 = vmul.f32 %v3898_v43, %v1275_v62 }
 0x24a   : > { %v1340_v29 = vadd.f32 %v1322_v25, %v3885_v37 }
 0x24b   : > { %2785 = vpow2.f32 %v2520_v21  ;;  %v3922_v16 = vadd.f32 %v1421_v30, %v1326_v54  ;;  %v1318_v21 = vmul.f32 %v3898_v43, %v1283_v47  ;;  %v1315_v47 = vmul.f32 %v3898_v43, %v3889_v35 }
 0x24c   : > { %v1348_v57 = vpop.permute.xlu1 %1347  ;;  %v1364_v58 = vpop.permute.xlu0 %1363 }
 0x24d   : > { %v2523_v3 = vmul.f32 -1.442695, %v3922_v16  ;;  %v1419_v10 = vmul.f32 %v3906_v32, %v1348_v57  ;;  %v1423_v56 = vmul.f32 %v3906_v32, %v1364_v58  ;;  %v1334_v57 = vadd.f32 %v1316_v39, %v3853_v2 }
 0x24f   : > { %2787 = vpow2.f32 %v2523_v3  ;;  %v3931_v14 = vadd.f32 %v1419_v10, %v1324_v36  ;;  %v3933_v6 = vadd.f32 %v1423_v56, %v1328_v51  ;;  %v1317_v10 = vmul.f32 %v3898_v43, %v3891_v34 }
 0x250   : > { %v1352_v33 = vpop.permute.xlu1 %1351  ;;  %v1372_v11 = vpop.permute.xlu0 %1371  ;;  %v1336_v56 = vadd.f32 %v1318_v21, %v3865_v4 }
 0x251   : > { %v2521_v7 = vmul.f32 -1.442695, %v3931_v14  ;;  %v2525_v61 = vmul.f32 -1.442695, %v3933_v6  ;;  %v1420_v42 = vmul.f32 %v3906_v32, %v1352_v33  ;;  %v1425_v18 = vmul.f32 %v3906_v32, %v1372_v11 }
 0x252   : > { %v1320_v11 = vmul.f32 %v3898_v43, %v3908_v60 }
 0x253   : > { %2789 = vpow2.f32 %v2521_v7  ;;  %v3943_v15 = vadd.f32 %v1420_v42, %v1325_v24  ;;  %v3945_v0 = vadd.f32 %v1425_v18, %v1330_v12  ;;  %v1333_v18 = vadd.f32 %v1315_v47, %v3851_v45 }
 0x254   : > { %2791 = vpow2.f32 %v2525_v61  ;;  %v1360_v38 = vpop.permute.xlu1 %1359  ;;  %v1380_v50 = vpop.permute.xlu0 %1379  ;;  %v1321_v47 = vmul.f32 %v3898_v43, %v3900_v23 }
 0x255   : > { %v2786_v59 = vpop.eup %2785  ;;  %v2522_v20 = vmul.f32 -1.442695, %v3943_v15  ;;  %v2527_v28 = vmul.f32 -1.442695, %v3945_v0  ;;  %v1422_v52 = vmul.f32 %v3906_v32, %v1360_v38  ;;  %v1427_v55 = vmul.f32 %v3906_v32, %v1380_v50 }
 0x256   : > { %v1508_v54 = vadd.f32 1.0, %v2786_v59 }
 0x257   : > { %2793 = vpow2.f32 %v2522_v20  ;;  %v3957_v49 = vadd.f32 %v1422_v52, %v1327_v19  ;;  %v3959_v8 = vadd.f32 %v1427_v55, %v1332_v46  ;;  %v1335_v19 = vadd.f32 %v1317_v10, %v3863_v17 }
 0x258   : > { %2795 = vrcp.f32 %v1508_v54  ;;  %v1368_v30 = vpop.permute.xlu1 %1367  ;;  %v1388_v36 = vpop.permute.xlu0 %1387  ;;  %v1338_v52 = vadd.f32 %v1320_v11, %v3877_v31 }
 0x259   : > { %v2788_v53 = vpop.eup %2787  ;;  %2797 = vpow2.f32 %v2527_v28  ;;  %v2524_v62 = vmul.f32 -1.442695, %v3957_v49  ;;  %v2529_v5 = vmul.f32 -1.442695, %v3959_v8  ;;  %v1424_v9 = vmul.f32 %v3906_v32, %v1368_v30 }
 0x25a   : > { %v1511_v58 = vadd.f32 1.0, %v2788_v53  ;;  %v1429_v51 = vmul.f32 %v3906_v32, %v1388_v36 }
 0x25b   : > { %2799 = vpow2.f32 %v2524_v62  ;;  %v3971_v3 = vadd.f32 %v1424_v9, %v1329_v1 }
 0x25c   : > { %2801 = vrcp.f32 %v1511_v58  ;;  %v3976_v24 = vadd.f32 %v1429_v51, %v1334_v57  ;;  %v1376_v2 = vpop.permute.xlu1 %1375  ;;  %v1396_v26 = vpop.permute.xlu0 %1395 }
 0x25d   : > { %v2790_v12 = vpop.eup %2789  ;;  %2803 = vpow2.f32 %v2529_v5  ;;  %v2526_v48 = vmul.f32 -1.442695, %v3971_v3  ;;  %v1426_v40 = vmul.f32 %v3906_v32, %v1376_v2  ;;  %v1431_v35 = vmul.f32 %v3906_v32, %v1396_v26 }
 0x25e   : > { %v2792_v33 = vpop.eup %2791  ;;  %v1509_v34 = vadd.f32 1.0, %v2790_v12  ;;  %v2531_v4 = vmul.f32 -1.442695, %v3976_v24 }
 0x25f   : > { %v1513_v7 = vadd.f32 1.0, %v2792_v33  ;;  %2805 = vpow2.f32 %v2526_v48  ;;  %v3984_v61 = vadd.f32 %v1426_v40, %v1331_v22  ;;  %v3986_v42 = vadd.f32 %v1431_v35, %v1336_v56 }
 0x260   : > { %2807 = vrcp.f32 %v1509_v34  ;;  %v1384_v46 = vpop.permute.xlu1 %1383  ;;  %v1404_v38 = vpop.permute.xlu0 %1403  ;;  %v1337_v22 = vadd.f32 %v1319_v41, %v3875_v13  ;;  %v1339_v33 = vadd.f32 %v1321_v47, %v3883_v27 }
 0x261   : > { %v2794_v60 = vpop.eup %2793  ;;  %2809 = vrcp.f32 %v1513_v7  ;;  %v2528_v50 = vmul.f32 -1.442695, %v3984_v61  ;;  %v2533_v59 = vmul.f32 -1.442695, %v3986_v42  ;;  %v1428_v20 = vmul.f32 %v3906_v32, %v1384_v46 }
 0x262   : > { %v2796_v28 = vpop.eup %2795  ;;  %v1510_v45 = vadd.f32 1.0, %v2794_v60  ;;  %2811 = vpow2.f32 %v2531_v4  ;;  %v1433_v17 = vmul.f32 %v3906_v32, %v1404_v38 }
 0x263   : > { %v2798_v55 = vpop.eup %2797  ;;  %v1562_v39 = vmul.f32 %v2796_v28, %v3913_v63  ;;  %2813 = vpow2.f32 %v2528_v50  ;;  %v4000_v54 = vadd.f32 %v1428_v20, %v1333_v18 }
 0x264   : > { %2815 = vrcp.f32 %v1510_v45  ;;  %v1515_v1 = vadd.f32 1.0, %v2798_v55  ;;  %v4003_v21 = vadd.f32 %v1433_v17, %v1338_v52  ;;  %v1392_v31 = vpop.permute.xlu1 %1391  ;;  %v1412_v30 = vpop.permute.xlu0 %1411 }
 0x265   : > { %v2800_v36 = vpop.eup %2799  ;;  %1580 = vst.msk [vmem:[#allocation2 + $0x1] sm:$0xff] %vm953_vm3, %v1562_v39  ;;  %2817 = vpow2.f32 %v2533_v59  ;;  %v2530_v53 = vmul.f32 -1.442695, %v4000_v54  ;;  %v1430_v44 = vmul.f32 %v3906_v32, %v1392_v31  ;;  %v1435_v63 = vmul.f32 %v3906_v32, %v1412_v30 }
 0x266   : > { %v2802_v62 = vpop.eup %2801  ;;  %2819 = vrcp.f32 %v1515_v1  ;;  %v1512_v5 = vadd.f32 1.0, %v2800_v36  ;;  %v2535_v37 = vmul.f32 -1.442695, %v4003_v21 }
 0x267   : > { %v2804_v9 = vpop.eup %2803  ;;  %v1565_v57 = vmul.f32 %v2802_v62, %v3922_v16  ;;  %2821 = vpow2.f32 %v2530_v53  ;;  %v4011_v58 = vadd.f32 %v1430_v44, %v1335_v19  ;;  %v4013_v51 = vadd.f32 %v1435_v63, %v1340_v29 }
 0x268   : > { %2823 = vrcp.f32 %v1512_v5  ;;  %v1517_v10 = vadd.f32 1.0, %v2804_v9  ;;  %v1400_v56 = vpop.permute.xlu1 %1399 }
 0x269   : > { %v2806_v2 = vpop.eup %2805  ;;  %1583 = vst.msk [vmem:[#allocation2 + $0x21] sm:$0xff] %vm953_vm3, %v1565_v57  ;;  %2825 = vpow2.f32 %v2535_v37  ;;  %v2532_v26 = vmul.f32 -1.442695, %v4011_v58  ;;  %v2537_v16 = vmul.f32 -1.442695, %v4013_v51  ;;  %v1432_v12 = vmul.f32 %v3906_v32, %v1400_v56 }
 0x26a   : > { %v2808_v48 = vpop.eup %2807  ;;  %2827 = vrcp.f32 %v1517_v10  ;;  %v1514_v40 = vadd.f32 1.0, %v2806_v2 }
 0x26b   : > { %v2810_v13 = vpop.eup %2809  ;;  %v1563_v35 = vmul.f32 %v2808_v48, %v3931_v14  ;;  %2829 = vpow2.f32 %v2532_v26  ;;  %v4023_v43 = vadd.f32 %v1432_v12, %v1337_v22 }
 0x26c   : > { %v2812_v23 = vpop.eup %2811  ;;  %v1567_v11 = vmul.f32 %v2810_v13, %v3933_v6  ;;  %2831 = vrcp.f32 %v1514_v40  ;;  %v1408_v34 = vpop.permute.xlu1 %1407 }
 0x26d   : > { %v2814_v4 = vpop.eup %2813  ;;  %1581 = vst.msk [vmem:[#allocation2 + $0x9] sm:$0xff] %vm953_vm3, %v1563_v35  ;;  %v1519_v7 = vadd.f32 1.0, %v2812_v23  ;;  %2833 = vpow2.f32 %v2537_v16  ;;  %v2534_v18 = vmul.f32 -1.442695, %v4023_v43  ;;  %v1434_v19 = vmul.f32 %v3906_v32, %v1408_v34 }
 0x26e   : > { %v2816_v14 = vpop.eup %2815  ;;  %1585 = vst.msk [vmem:[#allocation2 + $0x39] sm:$0xff] %vm953_vm3, %v1567_v11  ;;  %v1516_v25 = vadd.f32 1.0, %v2814_v4 }
 0x26f   : > { %v2818_v46 = vpop.eup %2817  ;;  %v1564_v27 = vmul.f32 %v2816_v14, %v3943_v15  ;;  %2835 = vrcp.f32 %v1519_v7  ;;  %v4032_v6 = vadd.f32 %v1434_v19, %v1339_v33 }
 0x270   : > { %v2820_v38 = vpop.eup %2819  ;;  %2837 = vrcp.f32 %v1516_v25  ;;  %v1521_v60 = vadd.f32 1.0, %v2818_v46 }
 0x271   : > { %v2822_v50 = vpop.eup %2821  ;;  %1582 = vst.msk [vmem:[#allocation2 + $0x19] sm:$0xff] %vm953_vm3, %v1564_v27  ;;  %v1569_v59 = vmul.f32 %v2820_v38, %v3945_v0  ;;  %2839 = vpow2.f32 %v2534_v18  ;;  %v2536_v32 = vmul.f32 -1.442695, %v4032_v6 }
 0x272   : > { %v2824_v20 = vpop.eup %2823  ;;  %2841 = vrcp.f32 %v1521_v60  ;;  %v1518_v28 = vadd.f32 1.0, %v2822_v50 }
 0x273   : > { %v2826_v52 = vpop.eup %2825  ;;  %1587 = vst.msk [vmem:[#allocation2 + $0x51] sm:$0xff] %vm953_vm3, %v1569_v59  ;;  %v1566_v15 = vmul.f32 %v2824_v20, %v3957_v49  ;;  %2843 = vpow2.f32 %v2536_v32 }
 0x274   : > { %v2828_v45 = vpop.eup %2827  ;;  %2845 = vrcp.f32 %v1518_v28  ;;  %v1523_v17 = vadd.f32 1.0, %v2826_v52 }
 0x275   : > { %v2830_v55 = vpop.eup %2829  ;;  %1584 = vst.msk [vmem:[#allocation2 + $0x31] sm:$0xff] %vm953_vm3, %v1566_v15  ;;  %v1571_v0 = vmul.f32 %v2828_v45, %v3959_v8 }
 0x276   : > { %v2832_v41 = vpop.eup %2831  ;;  %2847 = vrcp.f32 %v1523_v17  ;;  %v1520_v39 = vadd.f32 1.0, %v2830_v55 }
 0x277   : > { %v2834_v29 = vpop.eup %2833  ;;  %1589 = vst.msk [vmem:[#allocation2 + $0x69] sm:$0xff] %vm953_vm3, %v1571_v0  ;;  %v1568_v1 = vmul.f32 %v2832_v41, %v3971_v3 }
 0x278   : > { %2849 = vrcp.f32 %v1520_v39  ;;  %v1525_v31 = vadd.f32 1.0, %v2834_v29 }
 0x279   : > { %v2836_v49 = vpop.eup %2835  ;;  %1586 = vst.msk [vmem:[#allocation2 + $0x49] sm:$0xff] %vm953_vm3, %v1568_v1 }
 0x27a   : > { %v2838_v30 = vpop.eup %2837  ;;  %v1573_v36 = vmul.f32 %v2836_v49, %v3976_v24  ;;  %2851 = vrcp.f32 %v1525_v31 }
 0x27b   : > { %v2840_v53 = vpop.eup %2839  ;;  %v1570_v8 = vmul.f32 %v2838_v30, %v3984_v61 }
 0x27c   : > { %v2842_v44 = vpop.eup %2841  ;;  %1591 = vst.msk [vmem:[#allocation2 + $0x81] sm:$0xff] %vm953_vm3, %v1573_v36  ;;  %v1522_v63 = vadd.f32 1.0, %v2840_v53 }
 0x27d   : > { %v2844_v62 = vpop.eup %2843  ;;  %1588 = vst.msk [vmem:[#allocation2 + $0x61] sm:$0xff] %vm953_vm3, %v1570_v8  ;;  %v1575_v3 = vmul.f32 %v2842_v44, %v3986_v42 }
 0x27e   : > { %v2846_v5 = vpop.eup %2845  ;;  %2853 = vrcp.f32 %v1522_v63  ;;  %v1524_v37 = vadd.f32 1.0, %v2844_v62 }
 0x27f   : > { %1593 = vst.msk [vmem:[#allocation2 + $0x99] sm:$0xff] %vm953_vm3, %v1575_v3  ;;  %v1572_v24 = vmul.f32 %v2846_v5, %v4000_v54 }
 0x280   : > { %v2848_v9 = vpop.eup %2847  ;;  %2855 = vrcp.f32 %v1524_v37 }
 0x281   : > { %1590 = vst.msk [vmem:[#allocation2 + $0x79] sm:$0xff] %vm953_vm3, %v1572_v24  ;;  %v1577_v61 = vmul.f32 %v2848_v9, %v4003_v21 }
 0x282   : > { %v2850_v57 = vpop.eup %2849 }
 0x283   : > { %1595 = vst.msk [vmem:[#allocation2 + $0xb1] sm:$0xff] %vm953_vm3, %v1577_v61  ;;  %v1574_v22 = vmul.f32 %v2850_v57, %v4011_v58 }
 0x284   : > { %v2852_v47 = vpop.eup %2851 }
 0x285   : > { %1592 = vst.msk [vmem:[#allocation2 + $0x91] sm:$0xff] %vm953_vm3, %v1574_v22  ;;  %v1579_v42 = vmul.f32 %v2852_v47, %v4013_v51 }
 0x287   : > { %1597 = vst.msk [vmem:[#allocation2 + $0xc9] sm:$0xff] %vm953_vm3, %v1579_v42 }
 0x288   : > { %v2854_v10 = vpop.eup %2853 }
 0x289   : > { %v1576_v54 = vmul.f32 %v2854_v10, %v4023_v43 }
 0x28a   : > { %v2856_v56 = vpop.eup %2855 }
 0x28b   : > { %1594 = vst.msk [vmem:[#allocation2 + $0xa9] sm:$0xff] %vm953_vm3, %v1576_v54  ;;  %v1578_v21 = vmul.f32 %v2856_v56, %v4032_v6 }
 0x28d   : > { %1596 = vst.msk [vmem:[#allocation2 + $0xc1] sm:$0xff] %vm953_vm3, %v1578_v21 }
 0x28e PF: > { %v4065_v58 = vld [vmem:[%s4661_s4] ss:$0 sm:$0xff]  ;;  %v1658_v16 = vld [vmem:[#allocation2 + $0x1] sm:$0xff]  ;;  %v1765_v35 = vld [vmem:[#allocation2 + $0x18] sm:$0xff]  ;;  %vm2260_vm5 = vcmask 125952   ;;  %vm2277_vm6 = vcmask 130048  }
 0x28f   : > { %v1605_v2 = vld [vmem:[#allocation2] sm:$0xff]  ;;  %v1925_v27 = vld [vmem:[#allocation2 + $0x30] sm:$0xff]  ;;  %v4121_v20 = vld [vmem:[%s4660_s3 + $0x8] ss:$0 sm:$0xff]  ;;  %s2607_s17 = sshll.u32 %s3031_s24, 4  ;;  %s2584_s18 = sshll.u32 %s3035_s25, 5 }
 0x290   : > { %v4070_v51 = vld [vmem:[%s4660_s3] ss:$0 sm:$0xff]  ;;  %v4076_v12 = vld [vmem:[%s4660_s3 + $0x1] ss:$0 sm:$0xff]  ;;  %v1711_v48 = vld [vmem:[#allocation2 + $0x2] sm:$0xff]  ;;  %s2335_s9 = sadd.s32 %s2607_s17, %s2584_s18  ;;  %s2338_s20 = sshll.u32 %s3204_s12, 4  ;;  %s4567_s20 = int_to_ptr.vmem [resolvable:$true] %s2338_s20 }
 0x291   : > { %v1626_v26 = vmul.f32 %v4070_v51, %v1605_v2  ;;  %v1679_v40 = vmul.f32 %v4076_v12, %v1658_v16  ;;  %v4082_v13 = vld [vmem:[%s4660_s3 + $0x2] ss:$0 sm:$0xff]  ;;  %v4087_v43 = vld [vmem:[%s4660_s3 + $0x3] ss:$0 sm:$0xff]  ;;  %v1818_v11 = vld [vmem:[#allocation2 + $0x19] sm:$0xff]  ;;  %v1628_v7 = vmul.f32 %v4070_v51, %v1765_v35  ;;  %s2585_s19 = sshll.u32 %s2335_s9, 6 }
 0x292   : > { %v1732_v33 = vmul.f32 %v4082_v13, %v1711_v48  ;;  %v4094_v34 = vld [vmem:[%s4660_s3 + $0x4] ss:$0 sm:$0xff]  ;;  %v1871_v4 = vld [vmem:[#allocation2 + $0x1a] sm:$0xff]  ;;  %v4100_v18 = vld [vmem:[%s4660_s3 + $0x5] ss:$0 sm:$0xff]  ;;  %v1681_v14 = vmul.f32 %v4076_v12, %v1818_v11  ;;  %v1786_v46 = vmul.f32 %v4087_v43, %v1765_v35  ;;  %v1788_v1 = vmul.f32 %v4087_v43, %v1925_v27  ;;  %s4564_s14 = scalar_lea.hbm %s4662_s5, %s2585_s19  ;;  %s2921_s18 = scalar_lea.vmem %s4567_s20, 1024 }
 0x293   : > { %v1642_v23 = vadd.f32 %v4065_v58, %v1626_v26  ;;  %v4105_v19 = vld [vmem:[%s4660_s3 + $0x6] ss:$0 sm:$0xff]  ;;  %v1978_v6 = vld [vmem:[#allocation2 + $0x31] sm:$0xff]  ;;  %v4112_v38 = vld [vmem:[%s4660_s3 + $0x7] ss:$0 sm:$0xff]  ;;  %v1644_v60 = vadd.f32 %v4065_v58, %v1628_v7  ;;  %v1839_v50 = vmul.f32 %v4094_v34, %v1818_v11  ;;  %v1892_v59 = vmul.f32 %v4100_v18, %v1871_v4  ;;  %p2922_p1 = scmp.ne.s32.totalorder %s4567_s20, %s2921_s18  ;;  %s3060_s9 = smov [#allocation3]  }
 0x294   : > { %v1946_v32 = vmul.f32 %v4105_v19, %v1925_v27  ;;  %v1606_v28 = vld [vmem:[#allocation2 + $0x8] sm:$0xff]  ;;  %v1734_v15 = vmul.f32 %v4082_v13, %v1871_v4  ;;  %v1999_v17 = vmul.f32 %v4112_v38, %v1978_v6  ;;  %v2031_v55 = vld [vmem:[#allocation2 + $0x32] sm:$0xff]  ;;  %v1841_v31 = vmul.f32 %v4094_v34, %v1978_v6  ;;  %v1766_v44 = vld [vmem:[#allocation2 + $0x20] sm:$0xff]  ;;  %s2925_s19 = sshll.u32 %s3060_s9, 4  ;;  %s2926_s19 = int_to_ptr.vmem [resolvable:$false] %s2925_s19 }
 0x295   : > { %v1695_v25 = vadd.f32 %v1679_v40, %v1642_v23  ;;  %v1659_v52 = vld [vmem:[#allocation2 + $0x9] sm:$0xff]  ;;  %v1627_v0 = vmul.f32 %v4070_v51, %v1606_v28  ;;  %v1697_v29 = vadd.f32 %v1681_v14, %v1644_v60  ;;  %v1894_v49 = vmul.f32 %v4100_v18, %v2031_v55  ;;  %v1819_v63 = vld [vmem:[#allocation2 + $0x21] sm:$0xff]  ;;  %v1926_v24 = vld [vmem:[#allocation2 + $0x38] sm:$0xff]  ;;  %p2923_p2 = pnand %p2922_p1, %p3150_p3  ;;  %s2927_s29 = scalar_lea.vmem %s2926_s19, 2048 }
 0x296   : > { %v1680_v41 = vmul.f32 %v4076_v12, %v1659_v52  ;;  %v1712_v39 = vld [vmem:[#allocation2 + $0xa] sm:$0xff]  ;;  %v2052_v36 = vmul.f32 %v4121_v20, %v2031_v55  ;;  %v1872_v62 = vld [vmem:[#allocation2 + $0x22] sm:$0xff]  ;;  %v1787_v3 = vmul.f32 %v4087_v43, %v1766_v44  ;;  %v1840_v5 = vmul.f32 %v4094_v34, %v1819_v63  ;;  %v1979_v9 = vld [vmem:[#allocation2 + $0x39] sm:$0xff]  ;;  %p2928_p5 = scmp.lt.s32.totalorder %s4567_s20, %s2926_s19  ;;  %p2929_p6 = scmp.lt.s32.totalorder %s2927_s29, %s2921_s18 }
 0x297   : > { %v1748_v45 = vadd.f32 %v1732_v33, %v1695_v25  ;;  %v1643_v53 = vadd.f32 %v4065_v58, %v1627_v0  ;;  %v1733_v8 = vmul.f32 %v4082_v13, %v1712_v39  ;;  %v1893_v37 = vmul.f32 %v4100_v18, %v1872_v62  ;;  %v2032_v10 = vld [vmem:[#allocation2 + $0x3a] sm:$0xff]  ;;  %v4139_v21 = vld [vmem:[#allocation2 + $0x48] sm:$0xff]  ;;  %v4157_v52 = vld [vmem:[#allocation2 + $0x50] sm:$0xff]  ;;  %p2924_p4 = pneg %p2923_p2 }
 0x298   : > { %v1750_v61 = vadd.f32 %v1734_v15, %v1697_v29  ;;  %v1947_v47 = vmul.f32 %v4105_v19, %v1926_v24  ;;  %v2000_v42 = vmul.f32 %v4112_v38, %v1979_v9  ;;  %v2053_v54 = vmul.f32 %v4121_v20, %v2032_v10  ;;  %v4141_v2 = vld [vmem:[#allocation2 + $0x49] sm:$0xff]  ;;  %p2930_p7 = por %p2929_p6, %p2928_p5 }
 0x299   : > { %v1802_v30 = vadd.f32 %v1786_v46, %v1748_v45  ;;  %v1696_v22 = vadd.f32 %v1680_v41, %v1643_v53  ;;  %v1629_v26 = vmul.f32 %v4070_v51, %v1766_v44  ;;  %v1682_v16 = vmul.f32 %v4076_v12, %v1819_v63  ;;  %v4149_v33 = vld [vmem:[#allocation2 + $0x4a] sm:$0xff] }
 0x29a   : > { %v1804_v56 = vadd.f32 %v1788_v1, %v1750_v61  ;;  %v1948_v35 = vmul.f32 %v4105_v19, %v4139_v21  ;;  %v2001_v23 = vmul.f32 %v4112_v38, %v4141_v2  ;;  %v2054_v4 = vmul.f32 %v4121_v20, %v4149_v33  ;;  %p2931_p9 = pnand %p2930_p7, %p2924_p4 }
 0x29b   : > { %v1855_v57 = vadd.f32 %v1839_v50, %v1802_v30  ;;  %v1749_v40 = vadd.f32 %v1733_v8, %v1696_v22  ;;  %v1645_v7 = vadd.f32 %v4065_v58, %v1629_v26  ;;  %v1735_v14 = vmul.f32 %v4082_v13, %v1872_v62  ;;  %v4166_v30 = vld [vmem:[#allocation2 + $0x52] sm:$0xff] }
 0x29c   : > { %v1857_v11 = vadd.f32 %v1841_v31, %v1804_v56  ;;  %v1789_v60 = vmul.f32 %v4087_v43, %v1926_v24  ;;  %v1842_v50 = vmul.f32 %v4094_v34, %v1979_v9  ;;  %v1630_v15 = vmul.f32 %v4070_v51, %v1925_v27  ;;  %v4164_v31 = vld [vmem:[#allocation2 + $0x51] sm:$0xff] }
 0x29d   : > { %v1908_v48 = vadd.f32 %v1892_v59, %v1855_v57  ;;  %v1803_v46 = vadd.f32 %v1787_v3, %v1749_v40  ;;  %v1698_v28 = vadd.f32 %v1682_v16, %v1645_v7  ;;  %v1683_v45 = vmul.f32 %v4076_v12, %v1978_v6 }
 0x29e   : > { %v1910_v59 = vadd.f32 %v1894_v49, %v1857_v11  ;;  %v1895_v39 = vmul.f32 %v4100_v18, %v2032_v10  ;;  %v1646_v49 = vadd.f32 %v4065_v58, %v1630_v15  ;;  %v1736_v53 = vmul.f32 %v4082_v13, %v2031_v55 }
 0x29f   : > { %v1962_v25 = vadd.f32 %v1946_v32, %v1908_v48  ;;  %v1856_v41 = vadd.f32 %v1840_v5, %v1803_v46  ;;  %v1949_v32 = vmul.f32 %v4105_v19, %v4157_v52  ;;  %v1751_v1 = vadd.f32 %v1735_v14, %v1698_v28  ;;  %v4202_v46 = vld [vmem:[#allocation2 + $0x62] sm:$0xff] }
 0x2a0   : > { %v1964_v29 = vadd.f32 %v1948_v35, %v1910_v59  ;;  %v2055_v8 = vmul.f32 %v4121_v20, %v4166_v30  ;;  %v1699_v62 = vadd.f32 %v1683_v45, %v1646_v49  ;;  %v1790_v3 = vmul.f32 %v4087_v43, %v4139_v21  ;;  %v4209_v45 = vld [vmem:[#allocation2 + $0x68] sm:$0xff] }
 0x2a1   : > { %v2015_v0 = vadd.f32 %v1999_v17, %v1962_v25  ;;  %v1909_v6 = vadd.f32 %v1893_v37, %v1856_v41  ;;  %v2002_v17 = vmul.f32 %v4112_v38, %v4164_v31  ;;  %v1805_v63 = vadd.f32 %v1789_v60, %v1751_v1 }
 0x2a2   : > { %v2017_v44 = vadd.f32 %v2001_v23, %v1964_v29  ;;  %v1843_v55 = vmul.f32 %v4094_v34, %v4141_v2  ;;  %v1752_v22 = vadd.f32 %v1736_v53, %v1699_v62  ;;  %v1684_v56 = vmul.f32 %v4076_v12, %v1979_v9  ;;  %v4221_v53 = vld [vmem:[#allocation2 + $0x69] sm:$0xff] }
 0x2a3   : > { %v4170_v27 = vadd.f32 %v2052_v36, %v2015_v0  ;;  %v1963_v61 = vadd.f32 %v1947_v47, %v1909_v6  ;;  %v1631_v36 = vmul.f32 %v4070_v51, %v1926_v24  ;;  %v1858_v57 = vadd.f32 %v1842_v50, %v1805_v63  ;;  %v4190_v24 = vld [vmem:[#allocation2 + $0x60] sm:$0xff]  ;;  %v4223_v6 = vld [vmem:[#allocation2 + $0x6a] sm:$0xff] }
 0x2a4   : > { %v4182_v37 = vadd.f32 %v2054_v4, %v2017_v44  ;;  %v1737_v48 = vmul.f32 %v4082_v13, %v2032_v10  ;;  %v1806_v35 = vadd.f32 %v1790_v3, %v1752_v22  ;;  %v1896_v23 = vmul.f32 %v4100_v18, %v4149_v33  ;;  %v4196_v4 = vld [vmem:[#allocation2 + $0x61] sm:$0xff] }
 0x2a5   : > { %v2548_v5 = vmul.f32 -1.442695, %v4170_v27  ;;  %v2016_v26 = vadd.f32 %v2000_v42, %v1963_v61  ;;  %v1647_v16 = vadd.f32 %v4065_v58, %v1631_v36  ;;  %v1911_v47 = vadd.f32 %v1895_v39, %v1858_v57 }
 0x2a6   : > { %v2550_v40 = vmul.f32 -1.442695, %v4182_v37  ;;  %v1950_v9 = vmul.f32 %v4105_v19, %v4190_v24  ;;  %v1791_v10 = vmul.f32 %v4087_v43, %v4157_v52  ;;  %v1859_v14 = vadd.f32 %v1843_v55, %v1806_v35  ;;  %v4249_v35 = vld [vmem:[#allocation2 + $0x79] sm:$0xff] }
 0x2a7   : > { %2857 = vpow2.f32 %v2548_v5  ;;  %v4192_v11 = vadd.f32 %v2053_v54, %v2016_v26  ;;  %v1700_v42 = vadd.f32 %v1684_v56, %v1647_v16  ;;  %v1965_v7 = vadd.f32 %v1949_v32, %v1911_v47 }
 0x2a8   : > { %2859 = vpow2.f32 %v2550_v40  ;;  %v2003_v25 = vmul.f32 %v4112_v38, %v4196_v4  ;;  %v2056_v60 = vmul.f32 %v4121_v20, %v4202_v46  ;;  %v1844_v59 = vmul.f32 %v4094_v34, %v4164_v31 }
 0x2a9   : > { %v2549_v54 = vmul.f32 -1.442695, %v4192_v11  ;;  %v1753_v50 = vadd.f32 %v1737_v48, %v1700_v42  ;;  %v2018_v28 = vadd.f32 %v2002_v17, %v1965_v7  ;;  %v1912_v15 = vadd.f32 %v1896_v23, %v1859_v14  ;;  %v4245_v48 = vld [vmem:[#allocation2 + $0x78] sm:$0xff] }
 0x2aa   : > { %v1632_v0 = vmul.f32 %v4070_v51, %v4139_v21  ;;  %v1685_v41 = vmul.f32 %v4076_v12, %v4141_v2  ;;  %v1897_v32 = vmul.f32 %v4100_v18, %v4166_v30  ;;  %v1951_v29 = vmul.f32 %v4105_v19, %v4209_v45 }
 0x2ab   : > { %2861 = vpow2.f32 %v2549_v54  ;;  %v1807_v39 = vadd.f32 %v1791_v10, %v1753_v50  ;;  %v4219_v1 = vadd.f32 %v2055_v8, %v2018_v28  ;;  %v1966_v49 = vadd.f32 %v1950_v9, %v1912_v15 }
 0x2ac   : > { %v1648_v21 = vadd.f32 %v4065_v58, %v1632_v0  ;;  %v1738_v2 = vmul.f32 %v4082_v13, %v4149_v33  ;;  %v2004_v44 = vmul.f32 %v4112_v38, %v4221_v53  ;;  %v2057_v63 = vmul.f32 %v4121_v20, %v4223_v6 }
 0x2ad   : > { %v1860_v17 = vadd.f32 %v1844_v59, %v1807_v39  ;;  %v1792_v8 = vmul.f32 %v4087_v43, %v4190_v24  ;;  %v2551_v62 = vmul.f32 -1.442695, %v4219_v1  ;;  %v2019_v3 = vadd.f32 %v2003_v25, %v1966_v49  ;;  %v4257_v25 = vld [vmem:[#allocation2 + $0x7a] sm:$0xff] }
 0x2ae   : > { %v1701_v5 = vadd.f32 %v1685_v41, %v1648_v21  ;;  %v1845_v61 = vmul.f32 %v4094_v34, %v4196_v4  ;;  %v1898_v33 = vmul.f32 %v4100_v18, %v4202_v46  ;;  %v1633_v57 = vmul.f32 %v4070_v51, %v4157_v52 }
 0x2af   : > { %v1913_v36 = vadd.f32 %v1897_v32, %v1860_v17  ;;  %v1686_v22 = vmul.f32 %v4076_v12, %v4164_v31  ;;  %2863 = vpow2.f32 %v2551_v62  ;;  %v4243_v26 = vadd.f32 %v2056_v60, %v2019_v3  ;;  %v4274_v17 = vld [vmem:[#allocation2 + $0x80] sm:$0xff] }
 0x2b0   : > { %v1754_v16 = vadd.f32 %v1738_v2, %v1701_v5  ;;  %v1952_v47 = vmul.f32 %v4105_v19, %v4245_v48  ;;  %v1649_v23 = vadd.f32 %v4065_v58, %v1633_v57  ;;  %v1739_v52 = vmul.f32 %v4082_v13, %v4166_v30  ;;  %v4285_v5 = vld [vmem:[#allocation2 + $0x82] sm:$0xff] }
 0x2b1   : > { %v2858_v55 = vpop.eup %2857  ;;  %v1967_v40 = vadd.f32 %v1951_v29, %v1913_v36  ;;  %v2552_v31 = vmul.f32 -1.442695, %v4243_v26  ;;  %v2005_v10 = vmul.f32 %v4112_v38, %v4249_v35  ;;  %v1793_v60 = vmul.f32 %v4087_v43, %v4209_v45 }
 0x2b2   : > { %v2132_v56 = vadd.f32 1.0, %v2858_v55  ;;  %v2860_v9 = vpop.eup %2859  ;;  %v1808_v42 = vadd.f32 %v1792_v8, %v1754_v16  ;;  %v1702_v54 = vadd.f32 %v1686_v22, %v1649_v23  ;;  %v2058_v30 = vmul.f32 %v4121_v20, %v4257_v25 }
 0x2b3   : > { %v2134_v7 = vadd.f32 1.0, %v2860_v9  ;;  %v2020_v14 = vadd.f32 %v2004_v44, %v1967_v40  ;;  %v1846_v59 = vmul.f32 %v4094_v34, %v4221_v53  ;;  %v1634_v41 = vmul.f32 %v4070_v51, %v4190_v24  ;;  %v4276_v44 = vld [vmem:[#allocation2 + $0x81] sm:$0xff] }
 0x2b4   : > { %2865 = vrcp.f32 %v2132_v56  ;;  %v1861_v50 = vadd.f32 %v1845_v61, %v1808_v42  ;;  %v1755_v0 = vadd.f32 %v1739_v52, %v1702_v54  ;;  %v1899_v29 = vmul.f32 %v4100_v18, %v4223_v6 }
 0x2b5   : > { %2867 = vpow2.f32 %v2552_v31  ;;  %v2862_v28 = vpop.eup %2861  ;;  %v4265_v15 = vadd.f32 %v2057_v63, %v2020_v14  ;;  %v1687_v49 = vmul.f32 %v4076_v12, %v4196_v4  ;;  %v1650_v63 = vadd.f32 %v4065_v58, %v1634_v41  ;;  %v4307_v14 = vld [vmem:[#allocation2 + $0x90] sm:$0xff] }
 0x2b6   : > { %2869 = vrcp.f32 %v2134_v7  ;;  %v2133_v39 = vadd.f32 1.0, %v2862_v28  ;;  %v1914_v32 = vadd.f32 %v1898_v33, %v1861_v50  ;;  %v1809_v2 = vadd.f32 %v1793_v60, %v1755_v0 }
 0x2b7   : > { %v2553_v21 = vmul.f32 -1.442695, %v4265_v15  ;;  %v1740_v24 = vmul.f32 %v4082_v13, %v4202_v46  ;;  %v1953_v62 = vmul.f32 %v4105_v19, %v4274_v17  ;;  %v2006_v4 = vmul.f32 %v4112_v38, %v4276_v44 }
 0x2b8   : > { %2871 = vrcp.f32 %v2133_v39  ;;  %v1968_v8 = vadd.f32 %v1952_v47, %v1914_v32  ;;  %v1862_v3 = vadd.f32 %v1846_v59, %v1809_v2  ;;  %v1703_v61 = vadd.f32 %v1687_v49, %v1650_v63  ;;  %v4321_v32 = vld [vmem:[#allocation2 + $0x91] sm:$0xff] }
 0x2b9   : > { %2873 = vpow2.f32 %v2553_v21  ;;  %v1794_v55 = vmul.f32 %v4087_v43, %v4245_v48  ;;  %v2864_v36 = vpop.eup %2863  ;;  %v2059_v46 = vmul.f32 %v4121_v20, %v4285_v5  ;;  %v1847_v57 = vmul.f32 %v4094_v34, %v4249_v35 }
 0x2ba   : > { %v2021_v33 = vadd.f32 %v2005_v10, %v1968_v8  ;;  %v1635_v22 = vmul.f32 %v4070_v51, %v4209_v45  ;;  %v2135_v56 = vadd.f32 1.0, %v2864_v36  ;;  %v1915_v16 = vadd.f32 %v1899_v29, %v1862_v3  ;;  %v4323_v29 = vld [vmem:[#allocation2 + $0x92] sm:$0xff] }
 0x2bb   : > { %v1756_v40 = vadd.f32 %v1740_v24, %v1703_v61  ;;  %v1688_v47 = vmul.f32 %v4076_v12, %v4221_v53  ;;  %v1900_v9 = vmul.f32 %v4100_v18, %v4257_v25  ;;  %v1741_v42 = vmul.f32 %v4082_v13, %v4223_v6  ;;  %v4337_v3 = vld [vmem:[#allocation2 + $0x98] sm:$0xff] }
 0x2bc   : > { %v4297_v52 = vadd.f32 %v2058_v30, %v2021_v33  ;;  %v1651_v31 = vadd.f32 %v4065_v58, %v1635_v22  ;;  %2875 = vrcp.f32 %v2135_v56  ;;  %v1969_v45 = vadd.f32 %v1953_v62, %v1915_v16 }
 0x2bd   : > { %v1810_v7 = vadd.f32 %v1794_v55, %v1756_v40  ;;  %v1954_v60 = vmul.f32 %v4105_v19, %v4307_v14  ;;  %v1795_v30 = vmul.f32 %v4087_v43, %v4274_v17  ;;  %v1848_v0 = vmul.f32 %v4094_v34, %v4276_v44 }
 0x2be   : > { %v2866_v23 = vpop.eup %2865  ;;  %v2554_v54 = vmul.f32 -1.442695, %v4297_v52  ;;  %v1704_v50 = vadd.f32 %v1688_v47, %v1651_v31  ;;  %v2022_v28 = vadd.f32 %v2006_v4, %v1969_v45  ;;  %v2007_v2 = vmul.f32 %v4112_v38, %v4321_v32 }
 0x2bf   : > { %v4305_v10 = vmul.f32 %v2866_v23, %v4170_v27  ;;  %v2868_v53 = vpop.eup %2867  ;;  %v1863_v39 = vadd.f32 %v1847_v57, %v1810_v7  ;;  %v1901_v4 = vmul.f32 %v4100_v18, %v4285_v5  ;;  %v1955_v33 = vmul.f32 %v4105_v19, %v4337_v3 }
 0x2c0   : > { %v2870_v6 = vpop.eup %2869  ;;  %v2136_v59 = vadd.f32 1.0, %v2868_v53  ;;  %2877 = vpow2.f32 %v2554_v54  ;;  %v1757_v49 = vadd.f32 %v1741_v42, %v1704_v50  ;;  %v4327_v21 = vadd.f32 %v2059_v46, %v2022_v28  ;;  %v4356_v42 = vld [vmem:[#allocation2 + $0x9a] sm:$0xff] }
 0x2c1   : > { %v2591_v27 = vpack.c.bf16 %v4305_v10, %v4305_v10  ;;  %v4319_v41 = vmul.f32 %v2870_v6, %v4182_v37  ;;  %v2060_v37 = vmul.f32 %v4121_v20, %v4323_v29  ;;  %v1916_v8 = vadd.f32 %v1900_v9, %v1863_v39 }
 0x2c2   : > { %2879 = vrcp.f32 %v2136_v59  ;;  %v2872_v63 = vpop.eup %2871  ;;  %v1811_v62 = vadd.f32 %v1795_v30, %v1757_v49  ;;  %v2555_v36 = vmul.f32 -1.442695, %v4327_v21  ;;  %v1636_v46 = vmul.f32 %v4070_v51, %v4245_v48 }
 0x2c3   : > { %2261 = vst.msk [vmem:[%s3204_s12] sm:$0xf] %vm2260_vm5, %v2591_v27  ;;  %v2593_v24 = vpack.c.bf16 %v4319_v41, %v4319_v41  ;;  %v2874_v61 = vpop.eup %2873  ;;  %v2181_v55 = vmul.f32 %v2872_v63, %v4192_v11  ;;  %v1970_v22 = vadd.f32 %v1954_v60, %v1916_v8  ;;  %v1689_v16 = vmul.f32 %v4076_v12, %v4249_v35  ;;  %v4349_v11 = vld [vmem:[#allocation2 + $0x99] sm:$0xff] }
 0x2c4   : > { %v2137_v57 = vadd.f32 1.0, %v2874_v61  ;;  %v1864_v56 = vadd.f32 %v1848_v0, %v1811_v62  ;;  %2881 = vpow2.f32 %v2555_v36  ;;  %v1652_v47 = vadd.f32 %v4065_v58, %v1636_v46  ;;  %v4393_v36 = vld [vmem:[#allocation2 + $0xa9] sm:$0xff] }
 0x2c5   : > { %2263 = vst.msk [vmem:[%s3204_s12 + $0x8] sm:$0xf] %vm2260_vm5, %v2593_v24  ;;  %v2592_v40 = vpack.c.bf16 %v2181_v55, %v2181_v55  ;;  %v2023_v23 = vadd.f32 %v2007_v2, %v1970_v22  ;;  %v2008_v48 = vmul.f32 %v4112_v38, %v4349_v11  ;;  %v1742_v35 = vmul.f32 %v4082_v13, %v4257_v25 }
 0x2c6   : > { %2883 = vrcp.f32 %v2137_v57  ;;  %v1917_v9 = vadd.f32 %v1901_v4, %v1864_v56  ;;  %v2876_v31 = vpop.eup %2875  ;;  %v1705_v45 = vadd.f32 %v1689_v16, %v1652_v47  ;;  %v1796_v7 = vmul.f32 %v4087_v43, %v4307_v14 }
 0x2c7   : > { %2262 = vst.msk [vmem:[%s3204_s12 + $0x4] sm:$0xf] %vm2260_vm5, %v2592_v40  ;;  %v2183_v53 = vmul.f32 %v2876_v31, %v4219_v1  ;;  %v4363_v54 = vadd.f32 %v2060_v37, %v2023_v23  ;;  %v2061_v50 = vmul.f32 %v4121_v20, %v4356_v42  ;;  %v1849_v6 = vmul.f32 %v4094_v34, %v4321_v32  ;;  %v4404_v40 = vld [vmem:[#allocation2 + $0xaa] sm:$0xff] }
 0x2c8   : > { %v1971_v60 = vadd.f32 %v1955_v33, %v1917_v9  ;;  %v1758_v30 = vadd.f32 %v1742_v35, %v1705_v45  ;;  %v2278_v25 = vsel %vm2277_vm6, %v4305_v10, 0.0  ;;  %v2279_v39 = vsel %vm2277_vm6, %v2181_v55, 0.0  ;;  %v4382_v10 = vld [vmem:[#allocation2 + $0xa8] sm:$0xff] }
 0x2c9   : > { %v2594_v59 = vpack.c.bf16 %v2183_v53, %v2183_v53  ;;  %v2556_v28 = vmul.f32 -1.442695, %v4363_v54  ;;  %v1902_v37 = vmul.f32 %v4100_v18, %v4323_v29  ;;  %v1637_v8 = vmul.f32 %v4070_v51, %v4274_v17 }
 0x2ca   : > { %v2878_v27 = vpop.eup %2877  ;;  %v2024_v0 = vadd.f32 %v2008_v48, %v1971_v60  ;;  %v1812_v2 = vadd.f32 %v1796_v7, %v1758_v30  ;;  %v1956_v4 = vmul.f32 %v4105_v19, %v4382_v10  ;;  %v1690_v61 = vmul.f32 %v4076_v12, %v4276_v44 }
 0x2cb   : > { %v2138_v49 = vadd.f32 1.0, %v2878_v27  ;;  %2264 = vst.msk [vmem:[%s3204_s12 + $0xc] sm:$0xf] %vm2260_vm5, %v2594_v59  ;;  %2885 = vpow2.f32 %v2556_v28  ;;  %v1653_v33 = vadd.f32 %v4065_v58, %v1637_v8  ;;  %v1743_v17 = vmul.f32 %v4082_v13, %v4285_v5 }
 0x2cc   : > { %v2880_v1 = vpop.eup %2879  ;;  %v4380_v24 = vadd.f32 %v2061_v50, %v2024_v0  ;;  %v1865_v62 = vadd.f32 %v1849_v6, %v1812_v2  ;;  %v2281_v57 = vsel %vm2277_vm6, %v4319_v41, 0.0  ;;  %v2009_v44 = vmul.f32 %v4112_v38, %v4393_v36  ;;  %v4423_v6 = vld [vmem:[#allocation2 + $0xb0] sm:$0xff] }
 0x2cd   : > { %v4378_v63 = vmul.f32 %v2880_v1, %v4243_v26  ;;  %2887 = vrcp.f32 %v2138_v49  ;;  %v1706_v47 = vadd.f32 %v1690_v61, %v1653_v33  ;;  %v1797_v23 = vmul.f32 %v4087_v43, %v4337_v3  ;;  %v4435_v0 = vld [vmem:[#allocation2 + $0xb1] sm:$0xff] }
 0x2ce   : > { %v2557_v55 = vmul.f32 -1.442695, %v4380_v24  ;;  %v2882_v46 = vpop.eup %2881  ;;  %v1918_v22 = vadd.f32 %v1902_v37, %v1865_v62  ;;  %v2280_v5 = vadd.f32 %v2279_v39, %v2278_v25  ;;  %v2062_v48 = vmul.f32 %v4121_v20, %v4404_v40  ;;  %v4437_v1 = vld [vmem:[#allocation2 + $0xb2] sm:$0xff] }
 0x2cf   : > { %v2595_v26 = vpack.c.bf16 %v4378_v63, %v4378_v63  ;;  %v2139_v16 = vadd.f32 1.0, %v2882_v46  ;;  %v1759_v31 = vadd.f32 %v1743_v17, %v1706_v47  ;;  %v1850_v45 = vmul.f32 %v4094_v34, %v4349_v11  ;;  %v1937_v47 = vld [vmem:[#allocation2 + $0xc0] sm:$0xff] }
 0x2d0   : > { %v2884_v56 = vpop.eup %2883  ;;  %2889 = vpow2.f32 %v2557_v55  ;;  %v1972_v41 = vadd.f32 %v1956_v4, %v1918_v22  ;;  %v1638_v35 = vmul.f32 %v4070_v51, %v4307_v14  ;;  %v1903_v30 = vmul.f32 %v4100_v18, %v4356_v42 }
 0x2d1   : > { %2265 = vst.msk [vmem:[%s3204_s12 + $0x10] sm:$0xf] %vm2260_vm5, %v2595_v26  ;;  %v4409_v9 = vmul.f32 %v2884_v56, %v4265_v15  ;;  %2891 = vrcp.f32 %v2139_v16  ;;  %v1691_v15 = vmul.f32 %v4076_v12, %v4321_v32  ;;  %v1813_v50 = vadd.f32 %v1797_v23, %v1759_v31 }
 0x2d2   : > { %v2025_v60 = vadd.f32 %v2009_v44, %v1972_v41  ;;  %v1654_v27 = vadd.f32 %v4065_v58, %v1638_v35  ;;  %v1744_v25 = vmul.f32 %v4082_v13, %v4323_v29  ;;  %v2282_v59 = vadd.f32 %v2281_v57, %v2280_v5 }
 0x2d3   : > { %v2596_v7 = vpack.c.bf16 %v4409_v9, %v4409_v9  ;;  %v2283_v14 = vsel %vm2277_vm6, %v2183_v53, 0.0  ;;  %v1957_v32 = vmul.f32 %v4105_v19, %v4423_v6  ;;  %v1866_v49 = vadd.f32 %v1850_v45, %v1813_v50 }
 0x2d4   : > { %v4431_v28 = vadd.f32 %v2062_v48, %v2025_v60  ;;  %v2010_v2 = vmul.f32 %v4112_v38, %v4435_v0  ;;  %v2063_v29 = vmul.f32 %v4121_v20, %v4437_v1  ;;  %v1707_v53 = vadd.f32 %v1691_v15, %v1654_v27  ;;  %v1990_v60 = vld [vmem:[#allocation2 + $0xc1] sm:$0xff] }
 0x2d5   : > { %2266 = vst.msk [vmem:[%s3204_s12 + $0x14] sm:$0xf] %vm2260_vm5, %v2596_v7  ;;  %v2886_v39 = vpop.eup %2885  ;;  %v1798_v4 = vmul.f32 %v4087_v43, %v4382_v10  ;;  %v1639_v61 = vmul.f32 %v4070_v51, %v4337_v3  ;;  %v1919_v55 = vadd.f32 %v1903_v30, %v1866_v49  ;;  %v1692_v17 = vmul.f32 %v4076_v12, %v4349_v11 }
 0x2d6   : > { %v2140_v8 = vadd.f32 1.0, %v2886_v39  ;;  %v2558_v62 = vmul.f32 -1.442695, %v4431_v28  ;;  %v1760_v33 = vadd.f32 %v1744_v25, %v1707_v53  ;;  %v1851_v46 = vmul.f32 %v4094_v34, %v4393_v36 }
 0x2d7   : > { %v2888_v37 = vpop.eup %2887  ;;  %v1655_v57 = vadd.f32 %v4065_v58, %v1639_v61  ;;  %v1745_v22 = vmul.f32 %v4082_v13, %v4356_v42  ;;  %v1973_v3 = vadd.f32 %v1957_v32, %v1919_v55  ;;  %v1904_v56 = vmul.f32 %v4100_v18, %v4404_v40  ;;  %v1991_v61 = vld [vmem:[#allocation2 + $0xc9] sm:$0xff] }
 0x2d8   : > { %v4449_v26 = vmul.f32 %v2888_v37, %v4297_v52  ;;  %2893 = vrcp.f32 %v2140_v8  ;;  %v1814_v16 = vadd.f32 %v1798_v4, %v1760_v33  ;;  %v1799_v5 = vmul.f32 %v4087_v43, %v4423_v6  ;;  %v2044_v55 = vld [vmem:[#allocation2 + $0xca] sm:$0xff] }
 0x2d9   : > { %2895 = vpow2.f32 %v2558_v62  ;;  %v1708_v23 = vadd.f32 %v1692_v17, %v1655_v57  ;;  %v2284_v48 = vadd.f32 %v2283_v14, %v2282_v59  ;;  %v2026_v42 = vadd.f32 %v2010_v2, %v1973_v3  ;;  %v2043_v14 = vld [vmem:[#allocation2 + $0xc2] sm:$0xff] }
 0x2da   : > { %v2890_v44 = vpop.eup %2889  ;;  %v2597_v52 = vpack.c.bf16 %v4449_v26, %v4449_v26  ;;  %v1958_v31 = vmul.f32 %v4105_v19, %v1937_v47  ;;  %v1852_v45 = vmul.f32 %v4094_v34, %v4435_v0  ;;  %v1867_v7 = vadd.f32 %v1851_v46, %v1814_v16  ;;  %v1938_v2 = vld [vmem:[#allocation2 + $0xc8] sm:$0xff] }
 0x2db   : > { %v2141_v11 = vadd.f32 1.0, %v2890_v44  ;;  %v2892_v41 = vpop.eup %2891  ;;  %v1761_v15 = vadd.f32 %v1745_v22, %v1708_v23  ;;  %v2285_v50 = vsel %vm2277_vm6, %v4378_v63, 0.0  ;;  %v4474_v30 = vadd.f32 %v2063_v29, %v2026_v42 }
 0x2dc   : > { %2267 = vst.msk [vmem:[%s3204_s12 + $0x18] sm:$0xf] %vm2260_vm5, %v2597_v52  ;;  %v4470_v35 = vmul.f32 %v2892_v41, %v4327_v21  ;;  %v2011_v27 = vmul.f32 %v4112_v38, %v1990_v60  ;;  %v1640_v25 = vmul.f32 %v4070_v51, %v4382_v10  ;;  %v1920_v21 = vadd.f32 %v1904_v56, %v1867_v7 }
 0x2dd   : > { %2897 = vrcp.f32 %v2141_v11  ;;  %v1815_v32 = vadd.f32 %v1799_v5, %v1761_v15  ;;  %v1905_v39 = vmul.f32 %v4100_v18, %v4437_v1  ;;  %v2559_v49 = vmul.f32 -1.442695, %v4474_v30  ;;  %v1939_v11 = vld [vmem:[#allocation2 + $0xd8] sm:$0xff] }
 0x2de   : > { %v2598_v59 = vpack.c.bf16 %v4470_v35, %v4470_v35  ;;  %v2064_v63 = vmul.f32 %v4121_v20, %v2043_v14  ;;  %v1656_v29 = vadd.f32 %v4065_v58, %v1640_v25  ;;  %v1693_v53 = vmul.f32 %v4076_v12, %v4393_v36  ;;  %v2045_v25 = vld [vmem:[#allocation2 + $0xda] sm:$0xff] }
 0x2df   : > { %v1974_v10 = vadd.f32 %v1958_v31, %v1920_v21  ;;  %v1868_v37 = vadd.f32 %v1852_v45, %v1815_v32  ;;  %v1959_v8 = vmul.f32 %v4105_v19, %v1938_v2  ;;  %v1746_v62 = vmul.f32 %v4082_v13, %v4404_v40  ;;  %v1992_v31 = vld [vmem:[#allocation2 + $0xd9] sm:$0xff] }
 0x2e0   : > { %2268 = vst.msk [vmem:[%s3204_s12 + $0x1c] sm:$0xf] %vm2260_vm5, %v2598_v59  ;;  %v2286_v4 = vadd.f32 %v2285_v50, %v2284_v48  ;;  %2899 = vpow2.f32 %v2559_v49  ;;  %v1709_v33 = vadd.f32 %v1693_v53, %v1656_v29  ;;  %v1800_v17 = vmul.f32 %v4087_v43, %v1937_v47 }
 0x2e1   : > { %v2027_v57 = vadd.f32 %v2011_v27, %v1974_v10  ;;  %v1921_v22 = vadd.f32 %v1905_v39, %v1868_v37  ;;  %v2012_v36 = vmul.f32 %v4112_v38, %v1991_v61  ;;  %v2065_v44 = vmul.f32 %v4121_v20, %v2044_v55 }
 0x2e2   : > { %v2894_v46 = vpop.eup %2893  ;;  %v1762_v56 = vadd.f32 %v1746_v62, %v1709_v33  ;;  %v1853_v40 = vmul.f32 %v4094_v34, %v1990_v60  ;;  %v1641_v16 = vmul.f32 %v4070_v51, %v4423_v6  ;;  %v1694_v41 = vmul.f32 %v4076_v12, %v4435_v0 }
 0x2e3   : > { %v2896_v52 = vpop.eup %2895  ;;  %v4497_v3 = vmul.f32 %v2894_v46, %v4363_v54  ;;  %v4502_v23 = vadd.f32 %v2064_v63, %v2027_v57  ;;  %v1975_v5 = vadd.f32 %v1959_v8, %v1921_v22  ;;  %v1906_v42 = vmul.f32 %v4100_v18, %v2043_v14  ;;  %v1940_v63 = vld [vmem:[#allocation2 + $0xe0] sm:$0xff] }
 0x2e4   : > { %v2142_v47 = vadd.f32 1.0, %v2896_v52  ;;  %v1816_v54 = vadd.f32 %v1800_v17, %v1762_v56  ;;  %v1657_v45 = vadd.f32 %v4065_v58, %v1641_v16  ;;  %v1960_v60 = vmul.f32 %v4105_v19, %v1939_v11  ;;  %v2046_v17 = vld [vmem:[#allocation2 + $0xe2] sm:$0xff] }
 0x2e5   : > { %v2599_v48 = vpack.c.bf16 %v4497_v3, %v4497_v3  ;;  %v2560_v51 = vmul.f32 -1.442695, %v4502_v23  ;;  %v2028_v6 = vadd.f32 %v2012_v36, %v1975_v5  ;;  %v1747_v50 = vmul.f32 %v4082_v13, %v4437_v1 }
 0x2e6   : > { %2901 = vrcp.f32 %v2142_v47  ;;  %v1869_v0 = vadd.f32 %v1853_v40, %v1816_v54  ;;  %v1710_v15 = vadd.f32 %v1694_v41, %v1657_v45  ;;  %v2013_v58 = vmul.f32 %v4112_v38, %v1992_v31 }
 0x2e7   : > { %v2898_v7 = vpop.eup %2897  ;;  %2269 = vst.msk [vmem:[%s3204_s12 + $0x20] sm:$0xf] %vm2260_vm5, %v2599_v48  ;;  %2903 = vpow2.f32 %v2560_v51  ;;  %v4517_v27 = vadd.f32 %v2065_v44, %v2028_v6  ;;  %v1801_v59 = vmul.f32 %v4087_v43, %v1938_v2  ;;  %v1854_v39 = vmul.f32 %v4094_v34, %v1991_v61 }
 0x2e8   : > { %v2189_v12 = vmul.f32 %v2898_v7, %v4380_v24  ;;  %v1922_v14 = vadd.f32 %v1906_v42, %v1869_v0  ;;  %v1763_v32 = vadd.f32 %v1747_v50, %v1710_v15  ;;  %v2287_v24 = vsel %vm2277_vm6, %v4409_v9, 0.0  ;;  %v1993_v9 = vld [vmem:[#allocation2 + $0xe1] sm:$0xff] }
 0x2e9   : > { %v2561_v49 = vmul.f32 -1.442695, %v4517_v27  ;;  %v2066_v29 = vmul.f32 %v4121_v20, %v2045_v25  ;;  %v1907_v43 = vmul.f32 %v4100_v18, %v2044_v55  ;;  %v2288_v10 = vadd.f32 %v2287_v24, %v2286_v4 }
 0x2ea   : > { %v2600_v21 = vpack.c.bf16 %v2189_v12, %v2189_v12  ;;  %v2900_v13 = vpop.eup %2899  ;;  %v1976_v1 = vadd.f32 %v1960_v60, %v1922_v14  ;;  %v1817_v53 = vadd.f32 %v1801_v59, %v1763_v32  ;;  %v1961_v8 = vmul.f32 %v4105_v19, %v1940_v63 }
 0x2eb   : > { %v2143_v2 = vadd.f32 1.0, %v2900_v13  ;;  %2905 = vpow2.f32 %v2561_v49  ;;  %v2289_v62 = vsel %vm2277_vm6, %v4449_v26, 0.0  ;;  %v2014_v57 = vmul.f32 %v4112_v38, %v1993_v9 }
 0x2ec   : > { %2270 = vst.msk [vmem:[%s3204_s12 + $0x24] sm:$0xf] %vm2260_vm5, %v2600_v21  ;;  %v2029_v37 = vadd.f32 %v2013_v58, %v1976_v1  ;;  %v1870_v34 = vadd.f32 %v1854_v39, %v1817_v53  ;;  %v2290_v18 = vadd.f32 %v2289_v62, %v2288_v10  ;;  %v2291_v19 = vsel %vm2277_vm6, %v4470_v35, 0.0 }
 0x2ed   : > { %2907 = vrcp.f32 %v2143_v2  ;;  %v2067_v44 = vmul.f32 %v4121_v20, %v2046_v17  ;;  %v2295_v41 = vsel %vm2277_vm6, %v2189_v12, 0.0 }
 0x2ee   : > { %v2082_v61 = vadd.f32 %v2066_v29, %v2029_v37  ;;  %v1923_v33 = vadd.f32 %v1907_v43, %v1870_v34  ;;  %v2292_v40 = vadd.f32 %v2291_v19, %v2290_v18 }
 0x2f0   : > { %v2902_v46 = vpop.eup %2901  ;;  %v2562_v4 = vmul.f32 -1.442695, %v2082_v61  ;;  %v1977_v22 = vadd.f32 %v1961_v8, %v1923_v33 }
 0x2f1   : > { %v2190_v55 = vmul.f32 %v2902_v46, %v4431_v28  ;;  %v2904_v36 = vpop.eup %2903  ;;  %v2293_v28 = vsel %vm2277_vm6, %v4497_v3, 0.0 }
 0x2f2   : > { %v2144_v52 = vadd.f32 1.0, %v2904_v36  ;;  %2909 = vpow2.f32 %v2562_v4  ;;  %v2030_v56 = vadd.f32 %v2014_v57, %v1977_v22  ;;  %v2294_v35 = vadd.f32 %v2293_v28, %v2292_v40 }
 0x2f3   : > { %v2601_v26 = vpack.c.bf16 %v2190_v55, %v2190_v55  ;;  %v2297_v31 = vsel %vm2277_vm6, %v2190_v55, 0.0 }
 0x2f4   : > { %2911 = vrcp.f32 %v2144_v52  ;;  %v2083_v11 = vadd.f32 %v2067_v44, %v2030_v56  ;;  %v2296_v42 = vadd.f32 %v2295_v41, %v2294_v35 }
 0x2f5   : > { %2271 = vst.msk [vmem:[%s3204_s12 + $0x28] sm:$0xf] %vm2260_vm5, %v2601_v26  ;;  %v2906_v38 = vpop.eup %2905 }
 0x2f6   : > { %v2145_v16 = vadd.f32 1.0, %v2906_v38  ;;  %v2563_v5 = vmul.f32 -1.442695, %v2083_v11  ;;  %v2298_v51 = vadd.f32 %v2297_v31, %v2296_v42 }
 0x2f7   : > { %v2908_v47 = vpop.eup %2907 }
 0x2f8   : > { %v2191_v20 = vmul.f32 %v2908_v47, %v4474_v30  ;;  %2913 = vrcp.f32 %v2145_v16 }
 0x2f9   : > { %2915 = vpow2.f32 %v2563_v5 }
 0x2fa   : > { %v2602_v48 = vpack.c.bf16 %v2191_v20, %v2191_v20  ;;  %v2299_v30 = vsel %vm2277_vm6, %v2191_v20, 0.0 }
 0x2fb   : > { %v2300_v15 = vadd.f32 %v2299_v30, %v2298_v51 }
 0x2fc   : > { %v2910_v54 = vpop.eup %2909  ;;  %2272 = vst.msk [vmem:[%s3204_s12 + $0x2c] sm:$0xf] %vm2260_vm5, %v2602_v48 }
 0x2fd   : > { %v2146_v3 = vadd.f32 1.0, %v2910_v54 }
 0x2fe   : > { %v2912_v45 = vpop.eup %2911 }
 0x2ff   : > { %v2192_v7 = vmul.f32 %v2912_v45, %v4502_v23  ;;  %2917 = vrcp.f32 %v2146_v3 }
 0x301   : > { %v2603_v6 = vpack.c.bf16 %v2192_v7, %v2192_v7  ;;  %v2301_v58 = vsel %vm2277_vm6, %v2192_v7, 0.0 }
 0x302   : > { %v2914_v60 = vpop.eup %2913  ;;  %v2302_v23 = vadd.f32 %v2301_v58, %v2300_v15 }
 0x303   : > { %v2916_v12 = vpop.eup %2915  ;;  %2273 = vst.msk [vmem:[%s3204_s12 + $0x30] sm:$0xf] %vm2260_vm5, %v2603_v6  ;;  %v2193_v0 = vmul.f32 %v2914_v60, %v4517_v27 }
 0x304   : > { %v2147_v50 = vadd.f32 1.0, %v2916_v12 }
 0x305   : > { %v2604_v25 = vpack.c.bf16 %v2193_v0, %v2193_v0  ;;  %v2303_v21 = vsel %vm2277_vm6, %v2193_v0, 0.0 }
 0x306   : > { %2919 = vrcp.f32 %v2147_v50  ;;  %v2304_v32 = vadd.f32 %v2303_v21, %v2302_v23 }
 0x307   : > { %2274 = vst.msk [vmem:[%s3204_s12 + $0x34] sm:$0xf] %vm2260_vm5, %v2604_v25 }
 0x309   : > { %v2918_v59 = vpop.eup %2917 }
 0x30a   : > { %v2194_v14 = vmul.f32 %v2918_v59, %v2082_v61 }
 0x30c   : > { %v2605_v27 = vpack.c.bf16 %v2194_v14, %v2194_v14  ;;  %v2305_v39 = vsel %vm2277_vm6, %v2194_v14, 0.0 }
 0x30d   : > { %v2306_v49 = vadd.f32 %v2305_v39, %v2304_v32 }
 0x30e   : > { %2275 = vst.msk [vmem:[%s3204_s12 + $0x38] sm:$0xf] %vm2260_vm5, %v2605_v27 }
 0x310   : > { %v2920_v24 = vpop.eup %2919 }
 0x311   : > { %v2195_v63 = vmul.f32 %v2920_v24, %v2083_v11 }
 0x313   : > { %v2606_v13 = vpack.c.bf16 %v2195_v63, %v2195_v63  ;;  %v2307_v1 = vsel %vm2277_vm6, %v2195_v63, 0.0 }
 0x314   : > { %v2308_v29 = vadd.f32 %v2307_v1, %v2306_v49 }
 0x315   : > { %2276 = vst.msk [vmem:[%s3204_s12 + $0x3c] sm:$0xf] %vm2260_vm5, %v2606_v13 }
 0x316   : > { %v2309_v53 = vrot.slane %v2308_v29, 4 }
 0x317   : > { %2934 = shalt.err (!%p2931_p9)
}
 0x318   : > { %s2935_s12 = scalar_lea.hbm %s4564_s14, 1024  ;;  %s2939_s9 = scalar_lea.hbm %s4662_s5, 4096 }
 0x319   : > { %p2936_p10 = scmp.ne.s32.totalorder %s4564_s14, %s2935_s12  ;;  %p2940_p13 = scmp.lt.u32.totalorder %s4564_s14, %s4662_s5 }
 0x31a   : > { %p2941_p0 = scmp.lt.u32.totalorder %s2939_s9, %s2935_s12  ;;  %p2943_p2 = scmp.lt.u32.totalorder %s2935_s12, %s4564_s14 }
 0x31b   : > { %p2937_p11 = pnand %p2936_p10, %p3150_p3 }
 0x31c   : > { %p2942_p1 = por %p2941_p0, %p2940_p13 }
 0x31d   : > { %p2938_p12 = pneg %p2937_p11 }
 0x31e   : > { %p2944_p4 = por %p2943_p2, %p2942_p1 }
 0x320   : > { %p2945_p5 = pnand %p2944_p4, %p2938_p12 }
 0x322   : > { %2948 = shalt.err (!%p2945_p5)
}
 0x323   : > { %s3061_s18 = smov 64   ;;  %s3062_s17 = smov 4   ;;  %v2310_v43 = vadd.f32 %v2309_v53, %v2308_v29 }
 0x324   : > { %s4674_s0 = scalar_lea.sflag [#allocation4], %s3171_s16  ;;  %s2586_s29 = sshll.u32 %s3035_s25, 1 }
 0x325   : > { %2608 = dma.vmem_to_hbm [thread:$0]  (%p3150_p3), %s4567_s20, 1024, %s4564_s14, %s4674_s0, %s3061_s18, %s3061_s18, %s3062_s17   ;;  %v2311_v2 = vrot.slane %v2310_v43, 2 }
 0x326   : > { %s2352_s12 = sadd.s32 %s3031_s24, %s2586_s29  ;;  %s2356_s9 = sshll.u32 %s3206_s13, 4  ;;  %s4603_s9 = int_to_ptr.vmem [resolvable:$true] %s2356_s9 }
 0x327   : > { %v2312_v10 = vadd.f32 %v2311_v2, %v2310_v43  ;;  %s2587_s30 = sshll.u32 %s2352_s12, 7  ;;  %s2322_s25 = scalar_lea.sflag [#allocation6], %s3171_s16 }
 0x328   : > { %s4601_s2 = scalar_lea.hbm %s4663_s6, %s2587_s30  ;;  %s2949_s20 = scalar_lea.vmem %s4603_s9, 128 }
 0x329   : > { %v2313_v37 = vrot.slane %v2312_v10, 1  ;;  %p2950_p6 = scmp.ne.s32.totalorder %s4603_s9, %s2949_s20  ;;  %s3063_s24 = smov [#allocation5]  }
 0x32a   : > { %s2953_s14 = sshll.u32 %s3063_s24, 4  ;;  %s2954_s14 = int_to_ptr.vmem [resolvable:$false] %s2953_s14 }
 0x32b   : > { %v2314_v34 = vadd.f32 %v2313_v37, %v2312_v10  ;;  %p2951_p7 = pnand %p2950_p6, %p3150_p3  ;;  %s2955_s18 = scalar_lea.vmem %s2954_s14, 256 }
 0x32c   : > { %p2956_p10 = scmp.lt.s32.totalorder %s4603_s9, %s2954_s14  ;;  %p2957_p11 = scmp.lt.s32.totalorder %s2955_s18, %s2949_s20 }
 0x32d   : > { %2315 = vst.msk [vmem:[%s3206_s13] sm:$0xff] %vm2277_vm6, %v2314_v34  ;;  %p2952_p9 = pneg %p2951_p7 }
 0x32e   : > { %p2958_p12 = por %p2957_p11, %p2956_p10 }
 0x330   : > { %p2959_p13 = pnand %p2958_p12, %p2952_p9 }
 0x332   : > { %2962 = shalt.err (!%p2959_p13)
}
 0x333   : > { %s2963_s1 = scalar_lea.hbm %s4601_s2, 128  ;;  %s2967_s17 = scalar_lea.hbm %s4663_s6, 512 }
 0x334   : > { %p2964_p0 = scmp.ne.s32.totalorder %s4601_s2, %s2963_s1  ;;  %p2968_p4 = scmp.lt.u32.totalorder %s4601_s2, %s4663_s6 }
 0x335   : > { %p2969_p5 = scmp.lt.u32.totalorder %s2967_s17, %s2963_s1  ;;  %p2971_p7 = scmp.lt.u32.totalorder %s2963_s1, %s4601_s2 }
 0x336   : > { %p2965_p1 = pnand %p2964_p0, %p3150_p3 }
 0x337   : > { %p2970_p6 = por %p2969_p5, %p2968_p4 }
 0x338   : > { %p2966_p2 = pneg %p2965_p1 }
 0x339   : > { %p2972_p9 = por %p2971_p7, %p2970_p6 }
 0x33b   : > { %p2973_p10 = pnand %p2972_p9, %p2966_p2 }
 0x33d   : > { %2976 = shalt.err (!%p2973_p10)
}
 0x33e   : > { %2609 = dma.vmem_to_hbm [thread:$0]  (%p3150_p3), %s4603_s9, 128, %s4601_s2, %s2322_s25  }
 0x33f PF: > { %p2619_p11 = scmp.ge.s32.totalorder %s3047_s28, 2  ;;  %s2368_s12 = sand.u32 1, %s3019_s21  }
 0x340   : > { %s2369_s30 = scalar_lea.sflag [#allocation4], %s2368_s12 }
 0x341   : > { %p2613_p12 = pnand %p2619_p11, %p3159_p8 }
 0x343   : > { %3010 = dma.done.wait (!%p2613_p12), %s2369_s30, 1024  }
 0x344   : > { %3012 = vsyncadd (!%p2613_p12), %s2369_s30, 4294966272  ;;  %s2378_s19 = scalar_lea.sflag [#allocation6], %s2368_s12 }
 0x345   : > { %3014 = dma.done.wait (!%p2613_p12), %s2378_s19, 128  }
 0x346   : > { %3016 = vsyncadd (!%p2613_p12), %s2378_s19, 4294967168  ;;  %s23_s28 = sadd.s32 1, %s3047_s28   ;;  %s4675_s21 = smov %s3023_s22 }
 0x347   : > { %p20_p13 = scmp.ge.s32.totalorder %s23_s28, 6   ;;  %s4676_s22 = smov %s3027_s23 }
 0x348   : > { %s4677_s23 = smov %s3168_s15  ;;  %s4678_s24 = smov %s3039_s26 }
 0x349   : > { %s4679_s25 = smov %s3043_s27  ;;  %s4680_s26 = smov %s4683_s7 }
 0x34a   : > { %s4681_s27 = smov %s4687_s8  ;;  %22 = sbr.rel (!%p20_p13) target bundleno = 11 (0xb), region = 105 }
 0x351   :  { %2383 = vsyncpa [#allocation4], 1 }
 0x352   :  { %2385 = vsyncpa [#allocation4 + $0x1], 1 }
 0x353   :  { %2386 = vsyncpa [#allocation6], 1 }
 0x354   :  { %2388 = vsyncpa [#allocation6 + $0x1], 1 }

</bundles_post_ra>
